<compile_context>
chip_gen: v5e
topology: v5e:2x2
jax: 0.10.0
libtpu: 0.0.40
codegen_flags: <defaults>
</compile_context>

<pallas_src>
import functools
import math

import numpy as np
import jax
import jax.numpy as jnp
from jax import lax
from jax.experimental import pallas as pl
from jax.experimental.pallas import tpu as pltpu


_T_CHUNK = 8                  # timestep chunk for the hoisted projection stage
_NB_CAP = 256                 # batch-block cap (per-step MXU M dim saturates ~256)
_VMEM_BUDGET = 40 * 2**20     # budget for per-block buffers (fits v7x 64 MiB w/ margin)
_VMEM_LIMIT = 48 * 2**20      # scoped VMEM limit handed to Mosaic


def _round_up(x, m):
    return ((x + m - 1) // m) * m


# ------------------------------ fused kernel -------------------------------------

def _node_embed_kernel(seq_ref, lens_ref,
                       wp_ref, bp_ref,
                       wif_ref, bif_ref, whf_ref, bhnf_ref,
                       wib_ref, bib_ref, bhnb_ref,
                       wfcf_ref, wfcb_ref, bfc_ref,
                       o_ref, gxf_ref, *, t_valid, tc):
    Tp, NB, IN = seq_ref.shape
    Hp = o_ref.shape[-1]
    f32 = jnp.float32
    bf16 = jnp.bfloat16

    lens = lens_ref[...]                                       # (NB, 1) int32
    wp, bp = wp_ref[...], bp_ref[...]
    wif, bif = wif_ref[...], bif_ref[...]                      # r/z recurrent biases pre-folded

    # ---- stage 1 (chunked): proj + ReLU, hoisted input-gate matmul -> bf16 scratch,
    #      fused gather of x at t = len-1 for the single backward GRU step ----
    n_chunks = Tp // tc

    def chunk_body(c, x_last):
        t0 = pl.multiple_of(c * tc, tc)
        seq_c = seq_ref[pl.ds(t0, tc)]                         # (tc, NB, IN)
        x_c = jnp.maximum(
            jnp.dot(seq_c.reshape(tc * NB, IN).astype(bf16), wp,
                    preferred_element_type=f32) + bp, 0.0)     # (tc*NB, Hp) f32
        gx_c = jnp.dot(x_c.astype(bf16), wif,
                       preferred_element_type=f32) + bif       # (tc*NB, 3Hp) f32
        gxf_ref[pl.ds(t0, tc)] = gx_c.astype(bf16).reshape(tc, NB, 3 * Hp)
        t_iota = lax.broadcasted_iota(jnp.int32, (tc, NB, 1), 0) + t0
        onehot = (t_iota == (lens - 1)[None, :, :]).astype(f32)  # (tc, NB, 1)
        return x_last + jnp.sum(x_c.reshape(tc, NB, Hp) * onehot, axis=0)

    x_last = lax.fori_loop(0, n_chunks, chunk_body,
                           jnp.zeros((NB, Hp), f32))            # (NB, Hp)

    # ---- backward direction: ONE GRU step from zero hidden (h0 == 0, so h@w_hh_b == 0;
    #      r/z recurrent biases already folded into bib, only b_hn_b remains) ----
    gxb = jnp.dot(x_last.astype(bf16), wib_ref[...],
                  preferred_element_type=f32) + bib_ref[...]    # (NB, 3Hp)
    r_b = jax.nn.sigmoid(gxb[:, :Hp])
    z_b = jax.nn.sigmoid(gxb[:, Hp:2 * Hp])
    n_b = jnp.tanh(gxb[:, 2 * Hp:] + r_b * bhnb_ref[...])
    h_bwd = n_b - z_b * n_b                                     # == (1 - z) * n

    # ---- forward recurrence: only h @ w_hh_f (+ b_hn on the n gate) in the serial loop ----
    whf = whf_ref[...]                                          # (Hp, 3Hp) bf16
    bhn = bhnf_ref[...]                                         # (1, Hp)   f32

    def body(t, h):
        gx = gxf_ref[t].astype(f32)                             # (NB, 3Hp)
        gh = jnp.dot(h.astype(bf16), whf, preferred_element_type=f32)
        r = jax.nn.sigmoid(gx[:, :Hp] + gh[:, :Hp])
        z = jax.nn.sigmoid(gx[:, Hp:2 * Hp] + gh[:, Hp:2 * Hp])
        n = jnp.tanh(gx[:, 2 * Hp:] + r * (gh[:, 2 * Hp:] + bhn))
        h_new = n + z * (h - n)
        return jnp.where(t < lens, h_new, h)                    # freeze past len

    unroll = True if t_valid <= 8 else 4
    h_fwd = lax.fori_loop(0, t_valid, body, jnp.zeros((NB, Hp), f32), unroll=unroll)

    # ---- ReLU + fc, avoiding a sub-128-lane concat: two dots + add ----
    hf = jnp.maximum(h_fwd, 0.0).astype(bf16)
    hb = jnp.maximum(h_bwd, 0.0).astype(bf16)
    o_ref[...] = (jnp.dot(hf, wfcf_ref[...], preferred_element_type=f32)
                  + jnp.dot(hb, wfcb_ref[...], preferred_element_type=f32)
                  + bfc_ref[...])


def _full_block(arr):
    nd = arr.ndim
    return pl.BlockSpec(arr.shape, lambda i, _nd=nd: (0,) * _nd)


def node_embed_batch(seq_tm, lens, params, *, nb, t_valid, tc=_T_CHUNK):
    """seq_tm: (Tp, Np, IN) time-major f32; lens: (Np, 1) int32 -> (Np, Hp) f32."""
    Tp, Np, IN = seq_tm.shape
    Hp = params["b_proj"].shape[1]
    assert Np % nb == 0 and nb % 8 == 0 and Hp % 128 == 0 and Tp % tc == 0

    args = (seq_tm, lens,
            params["w_proj"], params["b_proj"],
            params["w_ih_f"], params["b_ih_f"], params["w_hh_f"], params["b_hn_f"],
            params["w_ih_b"], params["b_ih_b"], params["b_hn_b"],
            params["w_fc_f"], params["w_fc_b"], params["b_fc"])

    in_specs = [
        pl.BlockSpec((Tp, nb, IN), lambda i: (0, i, 0)),       # batch-blocked, time-major
        pl.BlockSpec((nb, 1), lambda i: (i, 0)),               # per-row lengths
    ] + [_full_block(a) for a in args[2:]]                     # weights: whole-array resident

    kernel = functools.partial(_node_embed_kernel, t_valid=t_valid, tc=tc)

    return pl.pallas_call(
        kernel,
        out_shape=jax.ShapeDtypeStruct((Np, Hp), jnp.float32),
        grid_spec=pltpu.PrefetchScalarGridSpec(
            num_scalar_prefetch=0,
            grid=(Np // nb,),
            in_specs=in_specs,
            out_specs=pl.BlockSpec((nb, Hp), lambda i: (i, 0)),
            scratch_shapes=[pltpu.VMEM((Tp, nb, 3 * Hp), jnp.bfloat16)],
        ),
        compiler_params=pltpu.CompilerParams(
            dimension_semantics=("parallel",),                 # independent batch blocks
            vmem_limit_bytes=_VMEM_LIMIT,
        ),
    )(*args)


def _pick_nb(n, Tp, in_dim, Hp):
    """Batch-block size: big (128-256) for throughput, >=2 blocks for v7x megacore,
    capped so per-block VMEM (bf16 gxf scratch + double-buffered seq + temps) fits."""
    per_seq = (Tp * (3 * Hp * 2 + 2 * in_dim * 4)              # bf16 gxf + 2x f32 seq block
               + _T_CHUNK * (30 * Hp + 8 * in_dim)             # chunk-stage f32/bf16 temps
               + 40 * Hp)                                      # recurrence-loop temps
    nb_vmem = max(8, (_VMEM_BUDGET // max(per_seq, 1)) // 8 * 8)
    if n <= 8:
        nb = 8                                                 # single block is unavoidable
    else:
        nb = min(_round_up((n + 1) // 2, 8), _NB_CAP)          # >=2 grid blocks when possible
    return int(max(8, min(nb, nb_vmem)))


# --------------------------------- NodeEmbed ------------------------------------

def _uniform(key, shape, bound):
    return jax.random.uniform(key, shape, jnp.float32, minval=-bound, maxval=bound)


def _pad2(w, shape):
    out = np.zeros(shape, np.float32)
    out[: w.shape[0], : w.shape[1]] = w
    return out


def _pad_gate_w(w, H, Hp):
    out = np.zeros((Hp, 3 * Hp), np.float32)
    for g in range(3):
        out[:H, g * Hp:g * Hp + H] = w[:, g * H:(g + 1) * H]
    return out


def _pad_gate_b(b, H, Hp):
    out = np.zeros((1, 3 * Hp), np.float32)
    for g in range(3):
        out[:, g * Hp:g * Hp + H] = b[:, g * H:(g + 1) * H]
    return out


class NodeEmbedPallas:
    """JAX/Pallas port of NodeEmbed.forward (== SimpleRNN.get_embedding + fc)."""

    def __init__(self, batch_size, in_dim, hidden_dim, key):
        self.batch_size = batch_size        # kept for API parity; one batched call replaces chunking
        self.in_dim = in_dim
        self.hidden_dim = hidden_dim
        H = hidden_dim
        Hp = _round_up(H, 128)              # lane-dense padded hidden size
        self.hp = Hp

        ks = jax.random.split(key, 12)
        kp = 1.0 / math.sqrt(in_dim)
        kh = 1.0 / math.sqrt(H)
        kf = 1.0 / math.sqrt(2 * H)

        # Raw parameters at PyTorch shapes / init (gate order r, z, n; stored transposed).
        w_proj = np.asarray(_uniform(ks[0], (in_dim, H), kp))
        b_proj = np.asarray(_uniform(ks[1], (1, H), kp))
        w_ih_f = np.asarray(_uniform(ks[2], (H, 3 * H), kh))
        w_hh_f = np.asarray(_uniform(ks[3], (H, 3 * H), kh))
        b_ih_f = np.asarray(_uniform(ks[4], (1, 3 * H), kh))
        b_hh_f = np.asarray(_uniform(ks[5], (1, 3 * H), kh))
        w_ih_b = np.asarray(_uniform(ks[6], (H, 3 * H), kh))
        # w_hh_b (ks[7]) never reaches the output: the backward output at the last valid
        # step is a single GRU step from zero hidden, so h0 @ w_hh_b == 0.
        b_ih_b = np.asarray(_uniform(ks[8], (1, 3 * H), kh))
        b_hh_b = np.asarray(_uniform(ks[9], (1, 3 * H), kh))
        w_fc = np.asarray(_uniform(ks[10], (2 * H, H), kf))
        b_fc = np.asarray(_uniform(ks[11], (1, H), kf))

        # Fold recurrent r/z biases into the input biases (removes a per-timestep
        # (NB,3Hp) broadcast add from the serial loop); only b_hn stays separate
        # because the reference multiplies it by r.
        b_ih_f_fold = b_ih_f.copy()
        b_ih_f_fold[:, :2 * H] += b_hh_f[:, :2 * H]
        b_hn_f = b_hh_f[:, 2 * H:3 * H]
        b_ih_b_fold = b_ih_b.copy()
        b_ih_b_fold[:, :2 * H] += b_hh_b[:, :2 * H]
        b_hn_b = b_hh_b[:, 2 * H:3 * H]

        # Lane-dense (Hp) padded parameters; MXU weights in bf16, biases in f32.
        bf16 = jnp.bfloat16
        self.params = {
            "w_proj": jnp.asarray(_pad2(w_proj, (in_dim, Hp)), bf16),
            "b_proj": jnp.asarray(_pad2(b_proj, (1, Hp))),
            "w_ih_f": jnp.asarray(_pad_gate_w(w_ih_f, H, Hp), bf16),
            "b_ih_f": jnp.asarray(_pad_gate_b(b_ih_f_fold, H, Hp)),
            "w_hh_f": jnp.asarray(_pad_gate_w(w_hh_f, H, Hp), bf16),
            "b_hn_f": jnp.asarray(_pad2(b_hn_f, (1, Hp))),
            "w_ih_b": jnp.asarray(_pad_gate_w(w_ih_b, H, Hp), bf16),
            "b_ih_b": jnp.asarray(_pad_gate_b(b_ih_b_fold, H, Hp)),
            "b_hn_b": jnp.asarray(_pad2(b_hn_b, (1, Hp))),
            "w_fc_f": jnp.asarray(_pad2(w_fc[:H, :], (Hp, Hp)), bf16),
            "w_fc_b": jnp.asarray(_pad2(w_fc[H:, :], (Hp, Hp)), bf16),
            "b_fc": jnp.asarray(_pad2(b_fc, (1, Hp))),
        }
        # TODO(synk): SimpleRNN.output Linear(2H, 2) is unused by NodeEmbed.forward; omitted.

    def forward(self, tid2idx, embeddings):
        in_dim, H, Hp = self.in_dim, self.hidden_dim, self.hp
        n = len(embeddings)

        # Host-side (numpy) batch assembly: padded time-major batch, single H2D copy.
        lens_list = [max(int(e.shape[1]), 1) for e in embeddings]   # empty -> one zero step
        max_len = max(lens_list)
        Tp = _round_up(max_len, _T_CHUNK)
        nb = _pick_nb(n, Tp, in_dim, Hp)
        Np = _round_up(max(n, nb), nb)

        seq_np = np.zeros((Tp, Np, in_dim), np.float32)              # time-major (T, N, IN)
        for i, e in enumerate(embeddings):
            L = int(e.shape[1])
            if L > 0:
                seq_np[:L, i, :] = np.asarray(e, dtype=np.float32)[0]
        lens_np = np.ones((Np, 1), np.int32)
        lens_np[:n, 0] = lens_list

        # TODO(synk): optional sort-by-length + per-block max-len scalar prefetch (dynamic
        # recurrence bound) skipped; the global max_len static bound is used instead.
        out = node_embed_batch(jnp.asarray(seq_np), jnp.asarray(lens_np),
                               self.params, nb=nb, t_valid=max_len)  # (Np, Hp)

        out_np = np.asarray(out[:n, :H])                             # single D2H pull
        return {tid: out_np[tid2idx[tid]][None, :] for tid in tid2idx}


# ----------------------------------- main ----------------------------------------

if __name__ == "__main__":
    BATCH_SIZE, IN_DIM, HIDDEN = 2, 8, 16
    key = jax.random.PRNGKey(0)
    k_model, k_data = jax.random.split(key)

    model = NodeEmbedPallas(BATCH_SIZE, IN_DIM, HIDDEN, k_model)

    # 5 variable-length "type" sequences, shape (1, L_i, IN_DIM); one empty.
    lengths = [3, 5, 0, 2, 4]
    dkeys = jax.random.split(k_data, len(lengths))
    embeddings = [
        jax.random.normal(dk, (1, L, IN_DIM), jnp.float32) if L > 0
        else jnp.zeros((1, 0, IN_DIM), jnp.float32)
        for dk, L in zip(dkeys, lengths)
    ]
    tid2idx = {f"tid_{i}": i for i in range(len(lengths))}

    tid2embeddings = model.forward(tid2idx, embeddings)

    for tid, emb in tid2embeddings.items():
        emb = jax.block_until_ready(emb)
        assert emb.shape == (1, HIDDEN)
        assert bool(jnp.all(jnp.isfinite(emb)))
    print("KERNEL_OK")
</pallas_src>

<mosaic_0001>
module attributes {stable_mosaic.version = 11 : i64} {
  func.func @_node_embed_kernel(%arg0: i32, %arg1: memref<8x8x8xf32, #tpu.memory_space<vmem>>, %arg2: memref<8x1xi32, #tpu.memory_space<vmem>>, %arg3: memref<8x128xbf16, #tpu.memory_space<vmem>>, %arg4: memref<1x128xf32, #tpu.memory_space<vmem>>, %arg5: memref<128x384xbf16, #tpu.memory_space<vmem>>, %arg6: memref<1x384xf32, #tpu.memory_space<vmem>>, %arg7: memref<128x384xbf16, #tpu.memory_space<vmem>>, %arg8: memref<1x128xf32, #tpu.memory_space<vmem>>, %arg9: memref<128x384xbf16, #tpu.memory_space<vmem>>, %arg10: memref<1x384xf32, #tpu.memory_space<vmem>>, %arg11: memref<1x128xf32, #tpu.memory_space<vmem>>, %arg12: memref<128x128xbf16, #tpu.memory_space<vmem>>, %arg13: memref<128x128xbf16, #tpu.memory_space<vmem>>, %arg14: memref<1x128xf32, #tpu.memory_space<vmem>>, %arg15: memref<8x128xf32, #tpu.memory_space<vmem>>, %arg16: memref<8x8x384xbf16, #tpu.memory_space<vmem>>) attributes {dimension_semantics = [#tpu.dimension_semantics<parallel>], iteration_bounds = array<i64: 1>, scalar_prefetch = 0 : i64, scratch_operands = 1 : i64, tpu.core_type = #tpu.core_type<tc>, window_params = [{transform_indices = @transform_0, window_bounds = array<i64: 8, 8, 8>}, {transform_indices = @transform_1, window_bounds = array<i64: 8, 1>}, {pipeline_mode = #tpu.pipeline_mode<synchronous>, transform_indices = @transform_2, window_bounds = array<i64: 8, 128>}, {pipeline_mode = #tpu.pipeline_mode<synchronous>, transform_indices = @transform_3, window_bounds = array<i64: 1, 128>}, {pipeline_mode = #tpu.pipeline_mode<synchronous>, transform_indices = @transform_4, window_bounds = array<i64: 128, 384>}, {pipeline_mode = #tpu.pipeline_mode<synchronous>, transform_indices = @transform_5, window_bounds = array<i64: 1, 384>}, {pipeline_mode = #tpu.pipeline_mode<synchronous>, transform_indices = @transform_6, window_bounds = array<i64: 128, 384>}, {pipeline_mode = #tpu.pipeline_mode<synchronous>, transform_indices = @transform_7, window_bounds = array<i64: 1, 128>}, {pipeline_mode = #tpu.pipeline_mode<synchronous>, transform_indices = @transform_8, window_bounds = array<i64: 128, 384>}, {pipeline_mode = #tpu.pipeline_mode<synchronous>, transform_indices = @transform_9, window_bounds = array<i64: 1, 384>}, {pipeline_mode = #tpu.pipeline_mode<synchronous>, transform_indices = @transform_10, window_bounds = array<i64: 1, 128>}, {pipeline_mode = #tpu.pipeline_mode<synchronous>, transform_indices = @transform_11, window_bounds = array<i64: 128, 128>}, {pipeline_mode = #tpu.pipeline_mode<synchronous>, transform_indices = @transform_12, window_bounds = array<i64: 128, 128>}, {pipeline_mode = #tpu.pipeline_mode<synchronous>, transform_indices = @transform_13, window_bounds = array<i64: 1, 128>}, {transform_indices = @transform_14, window_bounds = array<i64: 8, 128>}]} {
    %c0 = arith.constant 0 : index
    %c0_0 = arith.constant 0 : index
    %0 = vector.load %arg2[%c0, %c0_0] : memref<8x1xi32, #tpu.memory_space<vmem>>, vector<8x1xi32>
    %c0_1 = arith.constant 0 : index
    %c0_2 = arith.constant 0 : index
    %1 = vector.load %arg3[%c0_1, %c0_2] : memref<8x128xbf16, #tpu.memory_space<vmem>>, vector<8x128xbf16>
    %c0_3 = arith.constant 0 : index
    %c0_4 = arith.constant 0 : index
    %2 = vector.load %arg4[%c0_3, %c0_4] : memref<1x128xf32, #tpu.memory_space<vmem>>, vector<1x128xf32>
    %c0_5 = arith.constant 0 : index
    %c0_6 = arith.constant 0 : index
    %3 = vector.load %arg5[%c0_5, %c0_6] : memref<128x384xbf16, #tpu.memory_space<vmem>>, vector<128x384xbf16>
    %c0_7 = arith.constant 0 : index
    %c0_8 = arith.constant 0 : index
    %4 = vector.load %arg6[%c0_7, %c0_8] : memref<1x384xf32, #tpu.memory_space<vmem>>, vector<1x384xf32>
    %cst = arith.constant 0.000000e+00 : f32
    %5 = vector.broadcast %cst : f32 to vector<8x128xf32>
    %c0_i32 = arith.constant 0 : i32
    %c8_i32 = arith.constant 8 : i32
    %6 = arith.muli %c0_i32, %c8_i32 : i32
    %7 = tpu.assume_multiple %6, 8 : i32
    %8 = arith.index_cast %7 : i32 to index
    %c0_9 = arith.constant 0 : index
    %c0_10 = arith.constant 0 : index
    %9 = vector.load %arg1[%8, %c0_9, %c0_10] : memref<8x8x8xf32, #tpu.memory_space<vmem>>, vector<8x8x8xf32>
    %10 = vector.shape_cast %9 : vector<8x8x8xf32> to vector<64x8xf32>
    %11 = arith.truncf %10 : vector<64x8xf32> to vector<64x8xbf16>
    %cst_11 = arith.constant dense<0.000000e+00> : vector<64x128xf32>
    %12 = tpu.matmul %11, %1, %cst_11 {dimension_numbers = #tpu.dot_dimension_numbers<[1], [0], [0], [1], [0, 0, 1, 1], [], []>} : vector<64x8xbf16>, vector<8x128xbf16>, vector<64x128xf32> -> vector<64x128xf32>
    %13 = vector.broadcast %2 : vector<1x128xf32> to vector<64x128xf32>
    %14 = arith.addf %12, %13 : vector<64x128xf32>
    %cst_12 = arith.constant 0.000000e+00 : f32
    %15 = vector.broadcast %cst_12 : f32 to vector<64x128xf32>
    %16 = arith.maximumf %14, %15 : vector<64x128xf32>
    %17 = arith.truncf %16 : vector<64x128xf32> to vector<64x128xbf16>
    %cst_13 = arith.constant dense<0.000000e+00> : vector<64x384xf32>
    %18 = tpu.matmul %17, %3, %cst_13 {dimension_numbers = #tpu.dot_dimension_numbers<[1], [0], [0], [1], [0, 0, 1, 1], [], []>} : vector<64x128xbf16>, vector<128x384xbf16>, vector<64x384xf32> -> vector<64x384xf32>
    %19 = vector.broadcast %4 : vector<1x384xf32> to vector<64x384xf32>
    %20 = arith.addf %18, %19 : vector<64x384xf32>
    %21 = arith.truncf %20 : vector<64x384xf32> to vector<64x384xbf16>
    %22 = vector.shape_cast %21 : vector<64x384xbf16> to vector<8x8x384xbf16>
    %23 = arith.index_cast %7 : i32 to index
    %c0_14 = arith.constant 0 : index
    %c0_15 = arith.constant 0 : index
    %24 = vector.load %arg16[%23, %c0_14, %c0_15] : memref<8x8x384xbf16, #tpu.memory_space<vmem>>, vector<8x8x384xbf16>
    tpu.vector_store %arg16[%23, %c0_14, %c0_15], %22 {strides = array<i32>} : memref<8x8x384xbf16, #tpu.memory_space<vmem>>, vector<8x8x384xbf16>,
    %25 = tpu.iota {dimensions = array<i32: 0>} : vector<8x8x1xi32>
    %26 = vector.broadcast %7 : i32 to vector<8x8x1xi32>
    %27 = arith.addi %25, %26 : vector<8x8x1xi32>
    %c1_i32 = arith.constant 1 : i32
    %28 = vector.broadcast %c1_i32 : i32 to vector<8x1xi32>
    %29 = arith.subi %0, %28 : vector<8x1xi32>
    %30 = vector.shape_cast %29 : vector<8x1xi32> to vector<1x8x1xi32>
    %31 = vector.broadcast %30 : vector<1x8x1xi32> to vector<8x8x1xi32>
    %32 = arith.cmpi eq, %27, %31 : vector<8x8x1xi32>
    %33 = arith.extui %32 : vector<8x8x1xi1> to vector<8x8x1xi32>
    %34 = arith.sitofp %33 : vector<8x8x1xi32> to vector<8x8x1xf32>
    %35 = vector.shape_cast %16 : vector<64x128xf32> to vector<8x8x128xf32>
    %36 = vector.broadcast %34 : vector<8x8x1xf32> to vector<8x8x128xf32>
    %37 = arith.mulf %35, %36 : vector<8x8x128xf32>
    %cst_16 = arith.constant dense<0.000000e+00> : vector<8x128xf32>
    %38 = vector.multi_reduction <add>, %37, %cst_16 [0] : vector<8x8x128xf32> to vector<8x128xf32>
    %39 = arith.addf %5, %38 : vector<8x128xf32>
    %c1_i32_17 = arith.constant 1 : i32
    %40 = arith.truncf %39 : vector<8x128xf32> to vector<8x128xbf16>
    %c0_18 = arith.constant 0 : index
    %c0_19 = arith.constant 0 : index
    %41 = vector.load %arg9[%c0_18, %c0_19] : memref<128x384xbf16, #tpu.memory_space<vmem>>, vector<128x384xbf16>
    %cst_20 = arith.constant dense<0.000000e+00> : vector<8x384xf32>
    %42 = tpu.matmul %40, %41, %cst_20 {dimension_numbers = #tpu.dot_dimension_numbers<[1], [0], [0], [1], [0, 0, 1, 1], [], []>} : vector<8x128xbf16>, vector<128x384xbf16>, vector<8x384xf32> -> vector<8x384xf32>
    %c0_21 = arith.constant 0 : index
    %c0_22 = arith.constant 0 : index
    %43 = vector.load %arg10[%c0_21, %c0_22] : memref<1x384xf32, #tpu.memory_space<vmem>>, vector<1x384xf32>
    %44 = vector.broadcast %43 : vector<1x384xf32> to vector<8x384xf32>
    %45 = arith.addf %42, %44 : vector<8x384xf32>
    %46 = vector.extract_strided_slice %45 {offsets = [0, 0], sizes = [8, 128], strides = [1, 1]} : vector<8x384xf32> to vector<8x128xf32>
    %47 = arith.negf %46 : vector<8x128xf32>
    %48 = math.exp %47 : vector<8x128xf32>
    %cst_23 = arith.constant 1.000000e+00 : f32
    %49 = vector.broadcast %cst_23 : f32 to vector<8x128xf32>
    %50 = arith.addf %49, %48 : vector<8x128xf32>
    %51 = arith.divf %49, %50 : vector<8x128xf32>
    %52 = vector.extract_strided_slice %45 {offsets = [0, 128], sizes = [8, 128], strides = [1, 1]} : vector<8x384xf32> to vector<8x128xf32>
    %53 = arith.negf %52 : vector<8x128xf32>
    %54 = math.exp %53 : vector<8x128xf32>
    %cst_24 = arith.constant 1.000000e+00 : f32
    %55 = vector.broadcast %cst_24 : f32 to vector<8x128xf32>
    %56 = arith.addf %55, %54 : vector<8x128xf32>
    %57 = arith.divf %55, %56 : vector<8x128xf32>
    %58 = vector.extract_strided_slice %45 {offsets = [0, 256], sizes = [8, 128], strides = [1, 1]} : vector<8x384xf32> to vector<8x128xf32>
    %c0_25 = arith.constant 0 : index
    %c0_26 = arith.constant 0 : index
    %59 = vector.load %arg11[%c0_25, %c0_26] : memref<1x128xf32, #tpu.memory_space<vmem>>, vector<1x128xf32>
    %60 = vector.broadcast %59 : vector<1x128xf32> to vector<8x128xf32>
    %61 = arith.mulf %51, %60 : vector<8x128xf32>
    %62 = arith.addf %58, %61 : vector<8x128xf32>
    %63 = math.tanh %62 : vector<8x128xf32>
    %64 = arith.mulf %57, %63 : vector<8x128xf32>
    %65 = arith.subf %63, %64 : vector<8x128xf32>
    %c0_27 = arith.constant 0 : index
    %c0_28 = arith.constant 0 : index
    %66 = vector.load %arg7[%c0_27, %c0_28] : memref<128x384xbf16, #tpu.memory_space<vmem>>, vector<128x384xbf16>
    %c0_29 = arith.constant 0 : index
    %c0_30 = arith.constant 0 : index
    %67 = vector.load %arg8[%c0_29, %c0_30] : memref<1x128xf32, #tpu.memory_space<vmem>>, vector<1x128xf32>
    %cst_31 = arith.constant 0.000000e+00 : f32
    %68 = vector.broadcast %cst_31 : f32 to vector<8x128xf32>
    %c0_i32_32 = arith.constant 0 : i32
    %69 = arith.index_cast %c0_i32_32 : i32 to index
    %c0_33 = arith.constant 0 : index
    %c0_34 = arith.constant 0 : index
    %70 = vector.load %arg16[%69, %c0_33, %c0_34] : memref<8x8x384xbf16, #tpu.memory_space<vmem>>, vector<1x8x384xbf16>
    %71 = vector.shape_cast %70 : vector<1x8x384xbf16> to vector<8x384xbf16>
    %72 = arith.extf %71 : vector<8x384xbf16> to vector<8x384xf32>
    %73 = arith.truncf %68 : vector<8x128xf32> to vector<8x128xbf16>
    %cst_35 = arith.constant dense<0.000000e+00> : vector<8x384xf32>
    %74 = tpu.matmul %73, %66, %cst_35 {dimension_numbers = #tpu.dot_dimension_numbers<[1], [0], [0], [1], [0, 0, 1, 1], [], []>} : vector<8x128xbf16>, vector<128x384xbf16>, vector<8x384xf32> -> vector<8x384xf32>
    %75 = vector.extract_strided_slice %72 {offsets = [0, 0], sizes = [8, 128], strides = [1, 1]} : vector<8x384xf32> to vector<8x128xf32>
    %76 = vector.extract_strided_slice %74 {offsets = [0, 0], sizes = [8, 128], strides = [1, 1]} : vector<8x384xf32> to vector<8x128xf32>
    %77 = arith.addf %75, %76 : vector<8x128xf32>
    %78 = arith.negf %77 : vector<8x128xf32>
    %79 = math.exp %78 : vector<8x128xf32>
    %cst_36 = arith.constant 1.000000e+00 : f32
    %80 = vector.broadcast %cst_36 : f32 to vector<8x128xf32>
    %81 = arith.addf %80, %79 : vector<8x128xf32>
    %82 = arith.divf %80, %81 : vector<8x128xf32>
    %83 = vector.extract_strided_slice %72 {offsets = [0, 128], sizes = [8, 128], strides = [1, 1]} : vector<8x384xf32> to vector<8x128xf32>
    %84 = vector.extract_strided_slice %74 {offsets = [0, 128], sizes = [8, 128], strides = [1, 1]} : vector<8x384xf32> to vector<8x128xf32>
    %85 = arith.addf %83, %84 : vector<8x128xf32>
    %86 = arith.negf %85 : vector<8x128xf32>
    %87 = math.exp %86 : vector<8x128xf32>
    %cst_37 = arith.constant 1.000000e+00 : f32
    %88 = vector.broadcast %cst_37 : f32 to vector<8x128xf32>
    %89 = arith.addf %88, %87 : vector<8x128xf32>
    %90 = arith.divf %88, %89 : vector<8x128xf32>
    %91 = vector.extract_strided_slice %72 {offsets = [0, 256], sizes = [8, 128], strides = [1, 1]} : vector<8x384xf32> to vector<8x128xf32>
    %92 = vector.extract_strided_slice %74 {offsets = [0, 256], sizes = [8, 128], strides = [1, 1]} : vector<8x384xf32> to vector<8x128xf32>
    %93 = vector.broadcast %67 : vector<1x128xf32> to vector<8x128xf32>
    %94 = arith.addf %92, %93 : vector<8x128xf32>
    %95 = arith.mulf %82, %94 : vector<8x128xf32>
    %96 = arith.addf %91, %95 : vector<8x128xf32>
    %97 = math.tanh %96 : vector<8x128xf32>
    %98 = arith.subf %68, %97 : vector<8x128xf32>
    %99 = arith.mulf %90, %98 : vector<8x128xf32>
    %100 = arith.addf %97, %99 : vector<8x128xf32>
    %101 = vector.broadcast %c0_i32_32 : i32 to vector<8x1xi32>
    %102 = arith.cmpi slt, %101, %0 : vector<8x1xi32>
    %103 = vector.shape_cast %102 : vector<8x1xi1> to vector<8x1xi1>
    %104 = vector.broadcast %103 : vector<8x1xi1> to vector<8x128xi1>
    %105 = arith.select %104, %100, %68 : vector<8x128xi1>, vector<8x128xf32>
    %c1_i32_38 = arith.constant 1 : i32
    %106 = arith.index_cast %c1_i32_38 : i32 to index
    %c0_39 = arith.constant 0 : index
    %c0_40 = arith.constant 0 : index
    %107 = vector.load %arg16[%106, %c0_39, %c0_40] : memref<8x8x384xbf16, #tpu.memory_space<vmem>>, vector<1x8x384xbf16>
    %108 = vector.shape_cast %107 : vector<1x8x384xbf16> to vector<8x384xbf16>
    %109 = arith.extf %108 : vector<8x384xbf16> to vector<8x384xf32>
    %110 = arith.truncf %105 : vector<8x128xf32> to vector<8x128xbf16>
    %cst_41 = arith.constant dense<0.000000e+00> : vector<8x384xf32>
    %111 = tpu.matmul %110, %66, %cst_41 {dimension_numbers = #tpu.dot_dimension_numbers<[1], [0], [0], [1], [0, 0, 1, 1], [], []>} : vector<8x128xbf16>, vector<128x384xbf16>, vector<8x384xf32> -> vector<8x384xf32>
    %112 = vector.extract_strided_slice %109 {offsets = [0, 0], sizes = [8, 128], strides = [1, 1]} : vector<8x384xf32> to vector<8x128xf32>
    %113 = vector.extract_strided_slice %111 {offsets = [0, 0], sizes = [8, 128], strides = [1, 1]} : vector<8x384xf32> to vector<8x128xf32>
    %114 = arith.addf %112, %113 : vector<8x128xf32>
    %115 = arith.negf %114 : vector<8x128xf32>
    %116 = math.exp %115 : vector<8x128xf32>
    %cst_42 = arith.constant 1.000000e+00 : f32
    %117 = vector.broadcast %cst_42 : f32 to vector<8x128xf32>
    %118 = arith.addf %117, %116 : vector<8x128xf32>
    %119 = arith.divf %117, %118 : vector<8x128xf32>
    %120 = vector.extract_strided_slice %109 {offsets = [0, 128], sizes = [8, 128], strides = [1, 1]} : vector<8x384xf32> to vector<8x128xf32>
    %121 = vector.extract_strided_slice %111 {offsets = [0, 128], sizes = [8, 128], strides = [1, 1]} : vector<8x384xf32> to vector<8x128xf32>
    %122 = arith.addf %120, %121 : vector<8x128xf32>
    %123 = arith.negf %122 : vector<8x128xf32>
    %124 = math.exp %123 : vector<8x128xf32>
    %cst_43 = arith.constant 1.000000e+00 : f32
    %125 = vector.broadcast %cst_43 : f32 to vector<8x128xf32>
    %126 = arith.addf %125, %124 : vector<8x128xf32>
    %127 = arith.divf %125, %126 : vector<8x128xf32>
    %128 = vector.extract_strided_slice %109 {offsets = [0, 256], sizes = [8, 128], strides = [1, 1]} : vector<8x384xf32> to vector<8x128xf32>
    %129 = vector.extract_strided_slice %111 {offsets = [0, 256], sizes = [8, 128], strides = [1, 1]} : vector<8x384xf32> to vector<8x128xf32>
    %130 = vector.broadcast %67 : vector<1x128xf32> to vector<8x128xf32>
    %131 = arith.addf %129, %130 : vector<8x128xf32>
    %132 = arith.mulf %119, %131 : vector<8x128xf32>
    %133 = arith.addf %128, %132 : vector<8x128xf32>
    %134 = math.tanh %133 : vector<8x128xf32>
    %135 = arith.subf %105, %134 : vector<8x128xf32>
    %136 = arith.mulf %127, %135 : vector<8x128xf32>
    %137 = arith.addf %134, %136 : vector<8x128xf32>
    %138 = vector.broadcast %c1_i32_38 : i32 to vector<8x1xi32>
    %139 = arith.cmpi slt, %138, %0 : vector<8x1xi32>
    %140 = vector.shape_cast %139 : vector<8x1xi1> to vector<8x1xi1>
    %141 = vector.broadcast %140 : vector<8x1xi1> to vector<8x128xi1>
    %142 = arith.select %141, %137, %105 : vector<8x128xi1>, vector<8x128xf32>
    %c2_i32 = arith.constant 2 : i32
    %143 = arith.index_cast %c2_i32 : i32 to index
    %c0_44 = arith.constant 0 : index
    %c0_45 = arith.constant 0 : index
    %144 = vector.load %arg16[%143, %c0_44, %c0_45] : memref<8x8x384xbf16, #tpu.memory_space<vmem>>, vector<1x8x384xbf16>
    %145 = vector.shape_cast %144 : vector<1x8x384xbf16> to vector<8x384xbf16>
    %146 = arith.extf %145 : vector<8x384xbf16> to vector<8x384xf32>
    %147 = arith.truncf %142 : vector<8x128xf32> to vector<8x128xbf16>
    %cst_46 = arith.constant dense<0.000000e+00> : vector<8x384xf32>
    %148 = tpu.matmul %147, %66, %cst_46 {dimension_numbers = #tpu.dot_dimension_numbers<[1], [0], [0], [1], [0, 0, 1, 1], [], []>} : vector<8x128xbf16>, vector<128x384xbf16>, vector<8x384xf32> -> vector<8x384xf32>
    %149 = vector.extract_strided_slice %146 {offsets = [0, 0], sizes = [8, 128], strides = [1, 1]} : vector<8x384xf32> to vector<8x128xf32>
    %150 = vector.extract_strided_slice %148 {offsets = [0, 0], sizes = [8, 128], strides = [1, 1]} : vector<8x384xf32> to vector<8x128xf32>
    %151 = arith.addf %149, %150 : vector<8x128xf32>
    %152 = arith.negf %151 : vector<8x128xf32>
    %153 = math.exp %152 : vector<8x128xf32>
    %cst_47 = arith.constant 1.000000e+00 : f32
    %154 = vector.broadcast %cst_47 : f32 to vector<8x128xf32>
    %155 = arith.addf %154, %153 : vector<8x128xf32>
    %156 = arith.divf %154, %155 : vector<8x128xf32>
    %157 = vector.extract_strided_slice %146 {offsets = [0, 128], sizes = [8, 128], strides = [1, 1]} : vector<8x384xf32> to vector<8x128xf32>
    %158 = vector.extract_strided_slice %148 {offsets = [0, 128], sizes = [8, 128], strides = [1, 1]} : vector<8x384xf32> to vector<8x128xf32>
    %159 = arith.addf %157, %158 : vector<8x128xf32>
    %160 = arith.negf %159 : vector<8x128xf32>
    %161 = math.exp %160 : vector<8x128xf32>
    %cst_48 = arith.constant 1.000000e+00 : f32
    %162 = vector.broadcast %cst_48 : f32 to vector<8x128xf32>
    %163 = arith.addf %162, %161 : vector<8x128xf32>
    %164 = arith.divf %162, %163 : vector<8x128xf32>
    %165 = vector.extract_strided_slice %146 {offsets = [0, 256], sizes = [8, 128], strides = [1, 1]} : vector<8x384xf32> to vector<8x128xf32>
    %166 = vector.extract_strided_slice %148 {offsets = [0, 256], sizes = [8, 128], strides = [1, 1]} : vector<8x384xf32> to vector<8x128xf32>
    %167 = vector.broadcast %67 : vector<1x128xf32> to vector<8x128xf32>
    %168 = arith.addf %166, %167 : vector<8x128xf32>
    %169 = arith.mulf %156, %168 : vector<8x128xf32>
    %170 = arith.addf %165, %169 : vector<8x128xf32>
    %171 = math.tanh %170 : vector<8x128xf32>
    %172 = arith.subf %142, %171 : vector<8x128xf32>
    %173 = arith.mulf %164, %172 : vector<8x128xf32>
    %174 = arith.addf %171, %173 : vector<8x128xf32>
    %175 = vector.broadcast %c2_i32 : i32 to vector<8x1xi32>
    %176 = arith.cmpi slt, %175, %0 : vector<8x1xi32>
    %177 = vector.shape_cast %176 : vector<8x1xi1> to vector<8x1xi1>
    %178 = vector.broadcast %177 : vector<8x1xi1> to vector<8x128xi1>
    %179 = arith.select %178, %174, %142 : vector<8x128xi1>, vector<8x128xf32>
    %c3_i32 = arith.constant 3 : i32
    %180 = arith.index_cast %c3_i32 : i32 to index
    %c0_49 = arith.constant 0 : index
    %c0_50 = arith.constant 0 : index
    %181 = vector.load %arg16[%180, %c0_49, %c0_50] : memref<8x8x384xbf16, #tpu.memory_space<vmem>>, vector<1x8x384xbf16>
    %182 = vector.shape_cast %181 : vector<1x8x384xbf16> to vector<8x384xbf16>
    %183 = arith.extf %182 : vector<8x384xbf16> to vector<8x384xf32>
    %184 = arith.truncf %179 : vector<8x128xf32> to vector<8x128xbf16>
    %cst_51 = arith.constant dense<0.000000e+00> : vector<8x384xf32>
    %185 = tpu.matmul %184, %66, %cst_51 {dimension_numbers = #tpu.dot_dimension_numbers<[1], [0], [0], [1], [0, 0, 1, 1], [], []>} : vector<8x128xbf16>, vector<128x384xbf16>, vector<8x384xf32> -> vector<8x384xf32>
    %186 = vector.extract_strided_slice %183 {offsets = [0, 0], sizes = [8, 128], strides = [1, 1]} : vector<8x384xf32> to vector<8x128xf32>
    %187 = vector.extract_strided_slice %185 {offsets = [0, 0], sizes = [8, 128], strides = [1, 1]} : vector<8x384xf32> to vector<8x128xf32>
    %188 = arith.addf %186, %187 : vector<8x128xf32>
    %189 = arith.negf %188 : vector<8x128xf32>
    %190 = math.exp %189 : vector<8x128xf32>
    %cst_52 = arith.constant 1.000000e+00 : f32
    %191 = vector.broadcast %cst_52 : f32 to vector<8x128xf32>
    %192 = arith.addf %191, %190 : vector<8x128xf32>
    %193 = arith.divf %191, %192 : vector<8x128xf32>
    %194 = vector.extract_strided_slice %183 {offsets = [0, 128], sizes = [8, 128], strides = [1, 1]} : vector<8x384xf32> to vector<8x128xf32>
    %195 = vector.extract_strided_slice %185 {offsets = [0, 128], sizes = [8, 128], strides = [1, 1]} : vector<8x384xf32> to vector<8x128xf32>
    %196 = arith.addf %194, %195 : vector<8x128xf32>
    %197 = arith.negf %196 : vector<8x128xf32>
    %198 = math.exp %197 : vector<8x128xf32>
    %cst_53 = arith.constant 1.000000e+00 : f32
    %199 = vector.broadcast %cst_53 : f32 to vector<8x128xf32>
    %200 = arith.addf %199, %198 : vector<8x128xf32>
    %201 = arith.divf %199, %200 : vector<8x128xf32>
    %202 = vector.extract_strided_slice %183 {offsets = [0, 256], sizes = [8, 128], strides = [1, 1]} : vector<8x384xf32> to vector<8x128xf32>
    %203 = vector.extract_strided_slice %185 {offsets = [0, 256], sizes = [8, 128], strides = [1, 1]} : vector<8x384xf32> to vector<8x128xf32>
    %204 = vector.broadcast %67 : vector<1x128xf32> to vector<8x128xf32>
    %205 = arith.addf %203, %204 : vector<8x128xf32>
    %206 = arith.mulf %193, %205 : vector<8x128xf32>
    %207 = arith.addf %202, %206 : vector<8x128xf32>
    %208 = math.tanh %207 : vector<8x128xf32>
    %209 = arith.subf %179, %208 : vector<8x128xf32>
    %210 = arith.mulf %201, %209 : vector<8x128xf32>
    %211 = arith.addf %208, %210 : vector<8x128xf32>
    %212 = vector.broadcast %c3_i32 : i32 to vector<8x1xi32>
    %213 = arith.cmpi slt, %212, %0 : vector<8x1xi32>
    %214 = vector.shape_cast %213 : vector<8x1xi1> to vector<8x1xi1>
    %215 = vector.broadcast %214 : vector<8x1xi1> to vector<8x128xi1>
    %216 = arith.select %215, %211, %179 : vector<8x128xi1>, vector<8x128xf32>
    %c4_i32 = arith.constant 4 : i32
    %217 = arith.index_cast %c4_i32 : i32 to index
    %c0_54 = arith.constant 0 : index
    %c0_55 = arith.constant 0 : index
    %218 = vector.load %arg16[%217, %c0_54, %c0_55] : memref<8x8x384xbf16, #tpu.memory_space<vmem>>, vector<1x8x384xbf16>
    %219 = vector.shape_cast %218 : vector<1x8x384xbf16> to vector<8x384xbf16>
    %220 = arith.extf %219 : vector<8x384xbf16> to vector<8x384xf32>
    %221 = arith.truncf %216 : vector<8x128xf32> to vector<8x128xbf16>
    %cst_56 = arith.constant dense<0.000000e+00> : vector<8x384xf32>
    %222 = tpu.matmul %221, %66, %cst_56 {dimension_numbers = #tpu.dot_dimension_numbers<[1], [0], [0], [1], [0, 0, 1, 1], [], []>} : vector<8x128xbf16>, vector<128x384xbf16>, vector<8x384xf32> -> vector<8x384xf32>
    %223 = vector.extract_strided_slice %220 {offsets = [0, 0], sizes = [8, 128], strides = [1, 1]} : vector<8x384xf32> to vector<8x128xf32>
    %224 = vector.extract_strided_slice %222 {offsets = [0, 0], sizes = [8, 128], strides = [1, 1]} : vector<8x384xf32> to vector<8x128xf32>
    %225 = arith.addf %223, %224 : vector<8x128xf32>
    %226 = arith.negf %225 : vector<8x128xf32>
    %227 = math.exp %226 : vector<8x128xf32>
    %cst_57 = arith.constant 1.000000e+00 : f32
    %228 = vector.broadcast %cst_57 : f32 to vector<8x128xf32>
    %229 = arith.addf %228, %227 : vector<8x128xf32>
    %230 = arith.divf %228, %229 : vector<8x128xf32>
    %231 = vector.extract_strided_slice %220 {offsets = [0, 128], sizes = [8, 128], strides = [1, 1]} : vector<8x384xf32> to vector<8x128xf32>
    %232 = vector.extract_strided_slice %222 {offsets = [0, 128], sizes = [8, 128], strides = [1, 1]} : vector<8x384xf32> to vector<8x128xf32>
    %233 = arith.addf %231, %232 : vector<8x128xf32>
    %234 = arith.negf %233 : vector<8x128xf32>
    %235 = math.exp %234 : vector<8x128xf32>
    %cst_58 = arith.constant 1.000000e+00 : f32
    %236 = vector.broadcast %cst_58 : f32 to vector<8x128xf32>
    %237 = arith.addf %236, %235 : vector<8x128xf32>
    %238 = arith.divf %236, %237 : vector<8x128xf32>
    %239 = vector.extract_strided_slice %220 {offsets = [0, 256], sizes = [8, 128], strides = [1, 1]} : vector<8x384xf32> to vector<8x128xf32>
    %240 = vector.extract_strided_slice %222 {offsets = [0, 256], sizes = [8, 128], strides = [1, 1]} : vector<8x384xf32> to vector<8x128xf32>
    %241 = vector.broadcast %67 : vector<1x128xf32> to vector<8x128xf32>
    %242 = arith.addf %240, %241 : vector<8x128xf32>
    %243 = arith.mulf %230, %242 : vector<8x128xf32>
    %244 = arith.addf %239, %243 : vector<8x128xf32>
    %245 = math.tanh %244 : vector<8x128xf32>
    %246 = arith.subf %216, %245 : vector<8x128xf32>
    %247 = arith.mulf %238, %246 : vector<8x128xf32>
    %248 = arith.addf %245, %247 : vector<8x128xf32>
    %249 = vector.broadcast %c4_i32 : i32 to vector<8x1xi32>
    %250 = arith.cmpi slt, %249, %0 : vector<8x1xi32>
    %251 = vector.shape_cast %250 : vector<8x1xi1> to vector<8x1xi1>
    %252 = vector.broadcast %251 : vector<8x1xi1> to vector<8x128xi1>
    %253 = arith.select %252, %248, %216 : vector<8x128xi1>, vector<8x128xf32>
    %c5_i32 = arith.constant 5 : i32
    %cst_59 = arith.constant 0.000000e+00 : f32
    %254 = vector.broadcast %cst_59 : f32 to vector<8x128xf32>
    %255 = arith.maximumf %253, %254 : vector<8x128xf32>
    %256 = arith.truncf %255 : vector<8x128xf32> to vector<8x128xbf16>
    %cst_60 = arith.constant 0.000000e+00 : f32
    %257 = vector.broadcast %cst_60 : f32 to vector<8x128xf32>
    %258 = arith.maximumf %65, %257 : vector<8x128xf32>
    %259 = arith.truncf %258 : vector<8x128xf32> to vector<8x128xbf16>
    %c0_61 = arith.constant 0 : index
    %c0_62 = arith.constant 0 : index
    %260 = vector.load %arg12[%c0_61, %c0_62] : memref<128x128xbf16, #tpu.memory_space<vmem>>, vector<128x128xbf16>
    %cst_63 = arith.constant dense<0.000000e+00> : vector<8x128xf32>
    %261 = tpu.matmul %256, %260, %cst_63 {dimension_numbers = #tpu.dot_dimension_numbers<[1], [0], [0], [1], [0, 0, 1, 1], [], []>} : vector<8x128xbf16>, vector<128x128xbf16>, vector<8x128xf32> -> vector<8x128xf32>
    %c0_64 = arith.constant 0 : index
    %c0_65 = arith.constant 0 : index
    %262 = vector.load %arg13[%c0_64, %c0_65] : memref<128x128xbf16, #tpu.memory_space<vmem>>, vector<128x128xbf16>
    %cst_66 = arith.constant dense<0.000000e+00> : vector<8x128xf32>
    %263 = tpu.matmul %259, %262, %cst_66 {dimension_numbers = #tpu.dot_dimension_numbers<[1], [0], [0], [1], [0, 0, 1, 1], [], []>} : vector<8x128xbf16>, vector<128x128xbf16>, vector<8x128xf32> -> vector<8x128xf32>
    %264 = arith.addf %261, %263 : vector<8x128xf32>
    %c0_67 = arith.constant 0 : index
    %c0_68 = arith.constant 0 : index
    %265 = vector.load %arg14[%c0_67, %c0_68] : memref<1x128xf32, #tpu.memory_space<vmem>>, vector<1x128xf32>
    %266 = vector.broadcast %265 : vector<1x128xf32> to vector<8x128xf32>
    %267 = arith.addf %264, %266 : vector<8x128xf32>
    %c0_69 = arith.constant 0 : index
    %c0_70 = arith.constant 0 : index
    %268 = vector.load %arg15[%c0_69, %c0_70] : memref<8x128xf32, #tpu.memory_space<vmem>>, vector<8x128xf32>
    tpu.vector_store %arg15[%c0_69, %c0_70], %267 {strides = array<i32>} : memref<8x128xf32, #tpu.memory_space<vmem>>, vector<8x128xf32>,
    return
  }
  func.func @transform_0(%arg0: i32) -> (i32, i32, i32) {
    %c0_i32 = arith.constant 0 : i32
    %c0_i32_0 = arith.constant 0 : i32
    %c0_i32_1 = arith.constant 0 : i32
    return %c0_i32, %arg0, %c0_i32_0 : i32, i32, i32
  }
  func.func @transform_1(%arg0: i32) -> (i32, i32) {
    %c0_i32 = arith.constant 0 : i32
    %c0_i32_0 = arith.constant 0 : i32
    return %arg0, %c0_i32 : i32, i32
  }
  func.func @transform_2(%arg0: i32) -> (i32, i32) {
    %c0_i32 = arith.constant 0 : i32
    %c0_i32_0 = arith.constant 0 : i32
    %c0_i32_1 = arith.constant 0 : i32
    return %c0_i32, %c0_i32_0 : i32, i32
  }
  func.func @transform_3(%arg0: i32) -> (i32, i32) {
    %c0_i32 = arith.constant 0 : i32
    %c0_i32_0 = arith.constant 0 : i32
    %c0_i32_1 = arith.constant 0 : i32
    return %c0_i32, %c0_i32_0 : i32, i32
  }
  func.func @transform_4(%arg0: i32) -> (i32, i32) {
    %c0_i32 = arith.constant 0 : i32
    %c0_i32_0 = arith.constant 0 : i32
    %c0_i32_1 = arith.constant 0 : i32
    return %c0_i32, %c0_i32_0 : i32, i32
  }
  func.func @transform_5(%arg0: i32) -> (i32, i32) {
    %c0_i32 = arith.constant 0 : i32
    %c0_i32_0 = arith.constant 0 : i32
    %c0_i32_1 = arith.constant 0 : i32
    return %c0_i32, %c0_i32_0 : i32, i32
  }
  func.func @transform_6(%arg0: i32) -> (i32, i32) {
    %c0_i32 = arith.constant 0 : i32
    %c0_i32_0 = arith.constant 0 : i32
    %c0_i32_1 = arith.constant 0 : i32
    return %c0_i32, %c0_i32_0 : i32, i32
  }
  func.func @transform_7(%arg0: i32) -> (i32, i32) {
    %c0_i32 = arith.constant 0 : i32
    %c0_i32_0 = arith.constant 0 : i32
    %c0_i32_1 = arith.constant 0 : i32
    return %c0_i32, %c0_i32_0 : i32, i32
  }
  func.func @transform_8(%arg0: i32) -> (i32, i32) {
    %c0_i32 = arith.constant 0 : i32
    %c0_i32_0 = arith.constant 0 : i32
    %c0_i32_1 = arith.constant 0 : i32
    return %c0_i32, %c0_i32_0 : i32, i32
  }
  func.func @transform_9(%arg0: i32) -> (i32, i32) {
    %c0_i32 = arith.constant 0 : i32
    %c0_i32_0 = arith.constant 0 : i32
    %c0_i32_1 = arith.constant 0 : i32
    return %c0_i32, %c0_i32_0 : i32, i32
  }
  func.func @transform_10(%arg0: i32) -> (i32, i32) {
    %c0_i32 = arith.constant 0 : i32
    %c0_i32_0 = arith.constant 0 : i32
    %c0_i32_1 = arith.constant 0 : i32
    return %c0_i32, %c0_i32_0 : i32, i32
  }
  func.func @transform_11(%arg0: i32) -> (i32, i32) {
    %c0_i32 = arith.constant 0 : i32
    %c0_i32_0 = arith.constant 0 : i32
    %c0_i32_1 = arith.constant 0 : i32
    return %c0_i32, %c0_i32_0 : i32, i32
  }
  func.func @transform_12(%arg0: i32) -> (i32, i32) {
    %c0_i32 = arith.constant 0 : i32
    %c0_i32_0 = arith.constant 0 : i32
    %c0_i32_1 = arith.constant 0 : i32
    return %c0_i32, %c0_i32_0 : i32, i32
  }
  func.func @transform_13(%arg0: i32) -> (i32, i32) {
    %c0_i32 = arith.constant 0 : i32
    %c0_i32_0 = arith.constant 0 : i32
    %c0_i32_1 = arith.constant 0 : i32
    return %c0_i32, %c0_i32_0 : i32, i32
  }
  func.func @transform_14(%arg0: i32) -> (i32, i32) {
    %c0_i32 = arith.constant 0 : i32
    %c0_i32_0 = arith.constant 0 : i32
    return %arg0, %c0_i32 : i32, i32
  }
}

</mosaic_0001>

<bundles_post_ra>
// kernel: tpu_custom_call.1
= control target key start
LH: loop header
LB: loop body
LE: loop exit
PB: predicated region body
PF: predicated region fallthrough
CT: control target
= control target key end

     0   :  { %19 = vsyncpa [#allocation4], 0  ;;  %s2899_s0 = inlined_call_operand.hbm [shape: f32[8,8,8], index: 0, kind: input, shape index: {}]   ;;  %s2900_s1 = inlined_call_operand.vmem [shape: s32[8,1], index: 1, kind: input, shape index: {}]   ;;  %s2901_s2 = inlined_call_operand.vmem [shape: bf16[8,128], index: 2, kind: input, shape index: {}]   ;;  %s2902_s3 = inlined_call_operand.vmem [shape: f32[1,128], index: 3, kind: input, shape index: {}]   ;;  %s2903_s4 = inlined_call_operand.hbm [shape: bf16[128,384], index: 4, kind: input, shape index: {}]   ;;  %s2904_s5 = inlined_call_operand.vmem [shape: f32[1,384], index: 5, kind: input, shape index: {}]   ;;  %s2905_s6 = inlined_call_operand.hbm [shape: bf16[128,384], index: 6, kind: input, shape index: {}]   ;;  %s2906_s7 = inlined_call_operand.vmem [shape: f32[1,128], index: 7, kind: input, shape index: {}]   ;;  %s2907_s8 = inlined_call_operand.hbm [shape: bf16[128,384], index: 8, kind: input, shape index: {}]   ;;  %s2908_s9 = inlined_call_operand.vmem [shape: f32[1,384], index: 9, kind: input, shape index: {}]   ;;  %s2909_s10 = inlined_call_operand.vmem [shape: f32[1,128], index: 10, kind: input, shape index: {}]   ;;  %s2910_s11 = inlined_call_operand.hbm [shape: bf16[128,128], index: 11, kind: input, shape index: {}]   ;;  %s2911_s12 = inlined_call_operand.hbm [shape: bf16[128,128], index: 12, kind: input, shape index: {}]   ;;  %s2912_s13 = inlined_call_operand.vmem [shape: f32[1,128], index: 13, kind: input, shape index: {}]   ;;  %s2913_s14 = inlined_call_operand.hbm [shape: f32[8,128], index: 14, kind: output, shape index: {}]  }
   0x1   :  { %20 = vsyncpa [#allocation7], 0 }
   0x2   :  { %21 = vsyncpa [#allocation10], 0 }
   0x3   :  { %22 = vsyncpa [#allocation13], 0  ;;  %s47_s15 = sshll.u32 %s2903_s4, 4  ;;  %s48_s15 = int_to_ptr.hbm [resolvable:$true] %s47_s15 }
   0x4   :  { %23 = vsyncpa [#allocation5], 0  ;;  %s2463_s16 = smov [#allocation6]   ;;  %s77_s20 = sshll.u32 %s2907_s8, 4  ;;  %s78_s20 = int_to_ptr.hbm [resolvable:$true] %s77_s20 }
   0x5   :  { %s49_s17 = sshll.u32 %s2463_s16, 4  ;;  %s2464_s21 = smov 192   ;;  %s50_s17 = int_to_ptr.vmem [resolvable:$true] %s49_s17 }
   0x6   :  { %s2465_s22 = smov 12   ;;  %s2466_s23 = smov [#allocation9]  }
   0x7   :  { %55 = dma.hbm_to_vmem [thread:$0]  %s48_s15, 3072, %s50_s17, [#allocation7], %s2464_s21, %s2464_s21, %s2465_s22  }
   0x8   :  { %s79_s24 = sshll.u32 %s2466_s23, 4  ;;  %s28_s27 = sshll.u32 %s2899_s0, 4  ;;  %s80_s24 = int_to_ptr.vmem [resolvable:$true] %s79_s24  ;;  %s29_s27 = int_to_ptr.hbm [resolvable:$true] %s28_s27 }
   0x9   :  { %85 = dma.hbm_to_vmem [thread:$0]  %s78_s20, 3072, %s80_s24, [#allocation10], %s2464_s21, %s2464_s21, %s2465_s22  }
   0xa   :  { %s2467_s4 = smov [#allocation3]   ;;  %s62_s8 = sshll.u32 %s2905_s6, 4  ;;  %s63_s8 = int_to_ptr.hbm [resolvable:$true] %s62_s8 }
   0xb   :  { %s30_s28 = sshll.u32 %s2467_s4, 4  ;;  %s2468_s16 = smov 128   ;;  %s31_s28 = int_to_ptr.vmem [resolvable:$true] %s30_s28 }
   0xc   :  { %s2469_s18 = smov 8   ;;  %s2470_s15 = smov [#allocation8]  }
   0xd   :  { %36 = dma.hbm_to_vmem [thread:$0]  %s29_s27, 1024, %s31_s28, [#allocation4], %s2468_s16, %s2468_s16, %s2469_s18  }
   0xe   :  { %s64_s17 = sshll.u32 %s2470_s15, 4  ;;  %s94_s0 = sshll.u32 %s2910_s11, 4  ;;  %s65_s17 = int_to_ptr.vmem [resolvable:$true] %s64_s17  ;;  %s95_s0 = int_to_ptr.hbm [resolvable:$true] %s94_s0 }
   0xf   :  { %70 = dma.hbm_to_vmem [thread:$0]  %s63_s8, 3072, %s65_s17, [#allocation7], %s2464_s21, %s2464_s21, %s2465_s22  }
  0x10   :  { %s2471_s20 = smov [#allocation11]   ;;  %s107_s6 = sshll.u32 %s2911_s12, 4  ;;  %s108_s6 = int_to_ptr.hbm [resolvable:$true] %s107_s6 }
  0x11   :  { %s96_s24 = sshll.u32 %s2471_s20, 4  ;;  %s2472_s4 = smov 64   ;;  %s97_s24 = int_to_ptr.vmem [resolvable:$true] %s96_s24 }
  0x12   :  { %s2473_s29 = smov 4   ;;  %s2474_s27 = smov [#allocation12]  }
  0x13   :  { %102 = dma.hbm_to_vmem [thread:$0]  %s95_s0, 1024, %s97_s24, [#allocation10], %s2472_s4, %s2472_s4, %s2473_s29  }
  0x14   :  { %s109_s28 = sshll.u32 %s2474_s27, 4  ;;  %s110_s28 = int_to_ptr.vmem [resolvable:$true] %s109_s28 }
  0x15   :  { %115 = dma.hbm_to_vmem [thread:$0]  %s108_s6, 1024, %s110_s28, [#allocation13], %s2472_s4, %s2472_s4, %s2473_s29  }
  0x16   :  { %2453 = dma.done.wait [#allocation4], 1024  }
  0x17   :  { %2454 = vsyncadd [#allocation4], 4294966272 }
  0x18   :  { %2455 = dma.done.wait [#allocation7], 6144  }
  0x19   :  { %2456 = vsyncadd [#allocation7], 4294961152 }
  0x1a   :  { %2457 = dma.done.wait [#allocation10], 4096  }
  0x1b   :  { %2458 = vsyncadd [#allocation10], 4294963200 }
  0x1c   :  { %2459 = dma.done.wait [#allocation13], 1024  }
  0x1d   :  { %2460 = vsyncadd [#allocation13], 4294966272  ;;  %v2475_v0 = vmov 0   ;;  %vm209_vm0 = vcmask 1043456   ;;  %v144_v1 = vld [vmem:[%s2901_s2] sm:$0xf] }
  0x1e   :  { %2198 = vset.pattern.permute.xlu0 %v2475_v0  ;;  %2209 = vset.pattern.permute.xlu1 %v2475_v0  ;;  %v181_v2 = vld [vmem:[#allocation3] sm:$0xff]  ;;  %v182_v3 = vld [vmem:[#allocation3 + $0x8] sm:$0xff]  ;;  %v211_v4 = vsel %vm209_vm0, %v144_v1, 0  ;;  %vm196_vm1 = vcmask 64512   ;;  %v2476_v8 = vmov 0.0   ;;  %v183_v18 = vld [vmem:[#allocation3 + $0x10] sm:$0xff] }
  0x1f   :  { %2220 = vset.pattern.permute.xlu2 %v2475_v0  ;;  %v189_v5 = vpack.c.bf16 %v182_v3, %v181_v2  ;;  %v2580_v6 = vld [vmem:[%s2900_s1] sm:$0xff]  ;;  %220 = vmatpush.bf16.msra.mxu0 %v211_v4  ;;  %v184_v19 = vld [vmem:[#allocation3 + $0x18] sm:$0xff]  ;;  %v1791_v21 = vld [vmem:[#allocation6 + $0xa8] sm:$0xf]  ;;  %s2477_s17 = smov [#allocation14]   ;;  %s1688_s20 = sshll.u32 %s2913_s14, 4  ;;  %s1689_s20 = int_to_ptr.hbm [resolvable:$true] %s1688_s20 }
  0x20   :  { %v1801_v7 = vadd.s32 4294967295, %v2580_v6  ;;  %v190_v20 = vpack.c.bf16 %v184_v19, %v183_v18  ;;  %vm1310_vm10 = vcmp.gt.s32.totalorder %v2580_v6, 2  ;;  %v2117_v25 = vld [vmem:[#allocation6 + $0xb0] sm:$0xf0]  ;;  %v2116_v28 = vld [vmem:[#allocation6 + $0xac] sm:$0xf] }
  0x21   :  { %v1311_v24 = vsel %vm1310_vm10, 1, %v2475_v0  ;;  %v1792_v27 = vor.u32 %v2117_v25, %v1791_v21  ;;  %v1793_v29 = vld [vmem:[#allocation6 + $0xb4] sm:$0xf0]  ;;  %v1799_v30 = vld [vmem:[#allocation6 + $0xb0] sm:$0xf]  ;;  %vm1410_vm11 = vcmp.gt.s32.totalorder %v2580_v6, 3 }
  0x22   :  { %vm1802_vm2 = vcmp.eq.s32.totalorder %v1801_v7, 0  ;;  %vm1803_vm3 = vcmp.eq.s32.totalorder %v1801_v7, 1  ;;  %1701 = vmatmul.msk.bf16.vlgmr.msra.gmra.mxu0 %vm196_vm1, %v189_v5  ;;  %vm1804_vm4 = vcmp.eq.s32.totalorder %v1801_v7, 2  ;;  %vm1805_vm5 = vcmp.eq.s32.totalorder %v1801_v7, 3  ;;  %v2118_v32 = vld [vmem:[#allocation6 + $0xb8] sm:$0xf0] }
  0x23   :  { %v1810_v9 = vsel %vm1802_vm2, 1.0, %v2476_v8  ;;  %v1811_v10 = vsel %vm1803_vm3, 1.0, %v2476_v8  ;;  %vm1806_vm6 = vcmp.eq.s32.totalorder %v1801_v7, 4  ;;  %vm1807_vm7 = vcmp.eq.s32.totalorder %v1801_v7, 5  ;;  %v1779_v33 = vld [vmem:[#allocation6 + $0x90] sm:$0xf]  ;;  %389 = vmatpush.bf16.msra.mxu1 %v1792_v27 }
  0x24   :  { %v2199_v11 = vpack.i.bf16 %v1811_v10, %v1810_v9  ;;  %v1814_v12 = vsel %vm1806_vm6, 1.0, %v2476_v8  ;;  %v1815_v13 = vsel %vm1807_vm7, 1.0, %v2476_v8  ;;  %v1812_v15 = vsel %vm1804_vm4, 1.0, %v2476_v8  ;;  %v2114_v34 = vld [vmem:[#allocation6 + $0x98] sm:$0xf0]  ;;  %v185_v49 = vld [vmem:[#allocation3 + $0x20] sm:$0xff] }
  0x25   :  { %v2210_v14 = vpack.i.bf16 %v1815_v13, %v1814_v12  ;;  %v1813_v16 = vsel %vm1805_vm5, 1.0, %v2476_v8  ;;  %vm1808_vm8 = vcmp.eq.s32.totalorder %v1801_v7, 6  ;;  %vm1809_vm9 = vcmp.eq.s32.totalorder %v1801_v7, 7  ;;  %v2113_v37 = vld [vmem:[#allocation6 + $0x94] sm:$0xf]  ;;  %v186_v51 = vld [vmem:[#allocation3 + $0x28] sm:$0xff] }
  0x26   :  { %2200 = vperm.xlu0 %2198, %v2199_v11   ;;  %v2204_v17 = vpack.i.bf16 %v1813_v16, %v1812_v15  ;;  %v1816_v22 = vsel %vm1808_vm8, 1.0, %v2476_v8  ;;  %v1817_v23 = vsel %vm1809_vm9, 1.0, %v2476_v8  ;;  %v1796_v31 = vor.u32 %v2116_v28, %v1793_v29  ;;  %v1781_v38 = vld [vmem:[#allocation6 + $0x9c] sm:$0xf0]  ;;  %v1787_v39 = vld [vmem:[#allocation6 + $0x98] sm:$0xf] }
  0x27   :  { %2211 = vperm.xlu1 %2209, %v2210_v14   ;;  %v2215_v26 = vpack.i.bf16 %v1817_v23, %v1816_v22  ;;  %v1800_v35 = vor.u32 %v2118_v32, %v1799_v30  ;;  %v1780_v36 = vor.u32 %v2114_v34, %v1779_v33  ;;  %v1784_v40 = vor.u32 %v2113_v37, %v1781_v38  ;;  %v2115_v41 = vld [vmem:[#allocation6 + $0xa0] sm:$0xf0]  ;;  %v1767_v42 = vld [vmem:[#allocation6 + $0x78] sm:$0xf]  ;;  %v2110_v45 = vld [vmem:[#allocation6 + $0x7c] sm:$0xf] }
  0x28   :  { %418 = vmatpush.bf16.msra.mxu2 %v1796_v31  ;;  %v2111_v43 = vld [vmem:[#allocation6 + $0x80] sm:$0xf0]  ;;  %v1788_v44 = vor.u32 %v2115_v41, %v1787_v39  ;;  %v1769_v46 = vld [vmem:[#allocation6 + $0x84] sm:$0xf0]  ;;  %v1775_v47 = vld [vmem:[#allocation6 + $0x80] sm:$0xf]  ;;  %v191_v61 = vpack.c.bf16 %v186_v51, %v185_v49 }
  0x29   :  { %447 = vmatpush.bf16.msra.mxu3 %v1800_v35  ;;  %v2112_v48 = vld [vmem:[#allocation6 + $0x88] sm:$0xf0]  ;;  %390 = vmatpush.bf16.msra.mxu1 %v1780_v36  ;;  %v1768_v50 = vor.u32 %v2111_v43, %v1767_v42  ;;  %v1411_v52 = vsel %vm1410_vm11, 1, %v2475_v0  ;;  %v1772_v53 = vor.u32 %v2110_v45, %v1769_v46  ;;  %v1755_v54 = vld [vmem:[#allocation6 + $0x60] sm:$0xf]  ;;  %v187_v2 = vld [vmem:[#allocation3 + $0x30] sm:$0xff] }
  0x2a   :  { %v2108_v55 = vld [vmem:[#allocation6 + $0x68] sm:$0xf0]  ;;  %v1776_v56 = vor.u32 %v2112_v48, %v1775_v47  ;;  %v2107_v57 = vld [vmem:[#allocation6 + $0x64] sm:$0xf]  ;;  %v1757_v58 = vld [vmem:[#allocation6 + $0x6c] sm:$0xf0] }
  0x2b   :  { %v1763_v59 = vld [vmem:[#allocation6 + $0x68] sm:$0xf]  ;;  %v2109_v60 = vld [vmem:[#allocation6 + $0x70] sm:$0xf0]  ;;  %v1756_v62 = vor.u32 %v2108_v55, %v1755_v54  ;;  %v1760_v63 = vor.u32 %v2107_v57, %v1757_v58  ;;  %v188_v3 = vld [vmem:[#allocation3 + $0x38] sm:$0xff]  ;;  %vm1110_vm12 = vcmp.gt.s32.totalorder %v2580_v6, 0 }
  0x2c   :  { %419 = vmatpush.bf16.msra.mxu2 %v1784_v40  ;;  %v1764_v1 = vor.u32 %v2109_v60, %v1763_v59  ;;  %v192_v4 = vpack.c.bf16 %v188_v3, %v187_v2  ;;  %v1743_v5 = vld [vmem:[#allocation6 + $0x48] sm:$0xf]  ;;  %v2105_v7 = vld [vmem:[#allocation6 + $0x50] sm:$0xf0]  ;;  %v2104_v8 = vld [vmem:[#allocation6 + $0x4c] sm:$0xf] }
  0x2d   :  { %448 = vmatpush.bf16.msra.mxu3 %v1788_v44  ;;  %391 = vmatpush.bf16.msra.mxu1 %v1768_v50  ;;  %v1744_v9 = vor.u32 %v2105_v7, %v1743_v5  ;;  %v1745_v10 = vld [vmem:[#allocation6 + $0x54] sm:$0xf0]  ;;  %v1751_v11 = vld [vmem:[#allocation6 + $0x50] sm:$0xf]  ;;  %v2106_v12 = vld [vmem:[#allocation6 + $0x58] sm:$0xf0] }
  0x2e   :  { %2205 = vperm.xlu0 %2198, %v2204_v17   ;;  %v1748_v13 = vor.u32 %v2104_v8, %v1745_v10  ;;  %v1752_v14 = vor.u32 %v2106_v12, %v1751_v11  ;;  %v1731_v15 = vld [vmem:[#allocation6 + $0x30] sm:$0xf]  ;;  %v2102_v16 = vld [vmem:[#allocation6 + $0x38] sm:$0xf0]  ;;  %v2101_v17 = vld [vmem:[#allocation6 + $0x34] sm:$0xf] }
  0x2f   :  { %2216 = vperm.xlu1 %2209, %v2215_v26   ;;  %v1732_v18 = vor.u32 %v2102_v16, %v1731_v15  ;;  %v1733_v19 = vld [vmem:[#allocation6 + $0x3c] sm:$0xf0]  ;;  %v2103_v21 = vld [vmem:[#allocation6 + $0x40] sm:$0xf0]  ;;  %v2098_v26 = vld [vmem:[#allocation6 + $0x1c] sm:$0xf] }
  0x30   :  { %420 = vmatpush.bf16.msra.mxu2 %v1772_v53  ;;  %v1736_v22 = vor.u32 %v2101_v17, %v1733_v19  ;;  %v2099_v25 = vld [vmem:[#allocation6 + $0x20] sm:$0xf0]  ;;  %v1721_v28 = vld [vmem:[#allocation6 + $0x24] sm:$0xf0]  ;;  %v1727_v29 = vld [vmem:[#allocation6 + $0x20] sm:$0xf] }
  0x31   :  { %449 = vmatpush.bf16.msra.mxu3 %v1776_v56  ;;  %392 = vmatpush.bf16.msra.mxu1 %v1756_v62  ;;  %v2100_v30 = vld [vmem:[#allocation6 + $0x28] sm:$0xf0]  ;;  %v1724_v31 = vor.u32 %v2098_v26, %v1721_v28  ;;  %v1707_v33 = vld [vmem:[#allocation6] sm:$0xf]  ;;  %v2095_v35 = vld [vmem:[#allocation6 + $0x4] sm:$0xf] }
  0x32   :  { %1702 = vmatmul.msk.bf16.gmra.mxu0 %vm196_vm1, %v190_v20  ;;  %v1739_v20 = vld [vmem:[#allocation6 + $0x38] sm:$0xf]  ;;  %v1728_v32 = vor.u32 %v2100_v30, %v1727_v29  ;;  %v2096_v34 = vld [vmem:[#allocation6 + $0x8] sm:$0xf0]  ;;  %v1709_v37 = vld [vmem:[#allocation6 + $0xc] sm:$0xf0] }
  0x33   :  { %v1740_v23 = vor.u32 %v2103_v21, %v1739_v20  ;;  %v1708_v36 = vor.u32 %v2096_v34, %v1707_v33  ;;  %v1715_v38 = vld [vmem:[#allocation6 + $0x8] sm:$0xf]  ;;  %v2097_v39 = vld [vmem:[#allocation6 + $0x10] sm:$0xf0]  ;;  %v1712_v40 = vor.u32 %v2095_v35, %v1709_v37  ;;  %v1990_v48 = vld [vmem:[#allocation8 + $0x90] sm:$0xf] }
  0x34   :  { %421 = vmatpush.bf16.msra.mxu2 %v1760_v63  ;;  %v1716_v41 = vor.u32 %v2097_v39, %v1715_v38  ;;  %v2002_v42 = vld [vmem:[#allocation8 + $0xa8] sm:$0xf]  ;;  %v2165_v43 = vld [vmem:[#allocation8 + $0xb0] sm:$0xf0]  ;;  %v2162_v49 = vld [vmem:[#allocation8 + $0x98] sm:$0xf0] }
  0x35   :  { %450 = vmatpush.bf16.msra.mxu3 %v1764_v1  ;;  %393 = vmatpush.bf16.msra.mxu1 %v1744_v9  ;;  %v2591_v44 = vor.u32 %v2165_v43, %v2002_v42  ;;  %v1904_v45 = vld [vmem:[#allocation9 + $0xa8] sm:$0xf]  ;;  %v2141_v46 = vld [vmem:[#allocation9 + $0xb0] sm:$0xf0]  ;;  %v2594_v50 = vor.u32 %v2162_v49, %v1990_v48  ;;  %v1892_v51 = vld [vmem:[#allocation9 + $0x90] sm:$0xf] }
  0x36   :  { %1313 = vperm.xlu0 %2198, %v1311_v24   ;;  %v1719_v24 = vld [vmem:[#allocation6 + $0x18] sm:$0xf]  ;;  %v1905_v47 = vor.u32 %v2141_v46, %v1904_v45  ;;  %v2135_v55 = vld [vmem:[#allocation9 + $0x80] sm:$0xf0]  ;;  %v2132_v62 = vld [vmem:[#allocation9 + $0x68] sm:$0xf0] }
  0x37   :  { %1413 = vperm.xlu1 %2209, %v1411_v52   ;;  %v1720_v27 = vor.u32 %v2099_v25, %v1719_v24  ;;  %v2138_v52 = vld [vmem:[#allocation9 + $0x98] sm:$0xf0]  ;;  %v1880_v54 = vld [vmem:[#allocation9 + $0x78] sm:$0xf]  ;;  %v2159_v59 = vld [vmem:[#allocation8 + $0x80] sm:$0xf0] }
  0x38   :  { %422 = vmatpush.bf16.msra.mxu2 %v1748_v13  ;;  %769 = vmatpush.bf16.msrb.mxu0 %v1905_v47  ;;  %v1893_v53 = vor.u32 %v2138_v52, %v1892_v51  ;;  %v1881_v56 = vor.u32 %v2135_v55, %v1880_v54  ;;  %v1978_v58 = vld [vmem:[#allocation8 + $0x78] sm:$0xf]  ;;  %v2602_v1 = vld [vmem:[%s2902_s3] ss:$0 sm:$0xff]  ;;  %v2140_v2 = vld [vmem:[#allocation9 + $0xac] sm:$0xf] }
  0x39   :  { %451 = vmatpush.bf16.msra.mxu3 %v1752_v14  ;;  %394 = vmatpush.bf16.msra.mxu1 %v1732_v18  ;;  %v2597_v60 = vor.u32 %v2159_v59, %v1978_v58  ;;  %v1906_v3 = vld [vmem:[#allocation9 + $0xb4] sm:$0xf0]  ;;  %v1856_v5 = vld [vmem:[#allocation9 + $0x48] sm:$0xf]  ;;  %v2129_v7 = vld [vmem:[#allocation9 + $0x50] sm:$0xf0] }
  0x3a   :  { %v1857_v8 = vor.u32 %v2129_v7, %v1856_v5  ;;  %v1966_v10 = vld [vmem:[#allocation8 + $0x60] sm:$0xf]  ;;  %v2156_v11 = vld [vmem:[#allocation8 + $0x68] sm:$0xf0]  ;;  %v1844_v15 = vld [vmem:[#allocation9 + $0x30] sm:$0xf] }
  0x3b   :  { %v2608_v13 = vor.u32 %v2156_v11, %v1966_v10  ;;  %v2126_v16 = vld [vmem:[#allocation9 + $0x38] sm:$0xf0]  ;;  %v1832_v21 = vld [vmem:[#allocation9 + $0x18] sm:$0xf]  ;;  %v1912_v24 = vld [vmem:[#allocation9 + $0xb0] sm:$0xf] }
  0x3c   :  { %423 = vmatpush.bf16.msra.mxu2 %v1736_v22  ;;  %770 = vmatpush.bf16.msrb.mxu0 %v1893_v53  ;;  %v1845_v17 = vor.u32 %v2126_v16, %v1844_v15  ;;  %v2123_v22 = vld [vmem:[#allocation9 + $0x20] sm:$0xf0]  ;;  %v2142_v25 = vld [vmem:[#allocation9 + $0xb8] sm:$0xf0]  ;;  %v2137_v26 = vld [vmem:[#allocation9 + $0x94] sm:$0xf] }
  0x3d   :  { %452 = vmatpush.bf16.msra.mxu3 %v1740_v23  ;;  %395 = vmatpush.bf16.msra.mxu1 %v1720_v27  ;;  %v1833_v23 = vor.u32 %v2123_v22, %v1832_v21  ;;  %v1894_v27 = vld [vmem:[#allocation9 + $0x9c] sm:$0xf0]  ;;  %v1913_v28 = vor.u32 %v2142_v25, %v1912_v24  ;;  %v2120_v35 = vld [vmem:[#allocation9 + $0x8] sm:$0xf0]  ;;  %v1900_v37 = vld [vmem:[#allocation9 + $0x98] sm:$0xf] }
  0x3e   :  { %v1897_v30 = vor.u32 %v2137_v26, %v1894_v27  ;;  %v1820_v34 = vld [vmem:[#allocation9] sm:$0xf]  ;;  %v2139_v38 = vld [vmem:[#allocation9 + $0xa0] sm:$0xf0]  ;;  %v2164_v39 = vld [vmem:[#allocation8 + $0xac] sm:$0xf] }
  0x3f   :  { %v1901_v42 = vor.u32 %v2139_v38, %v1900_v37  ;;  %v2004_v45 = vld [vmem:[#allocation8 + $0xb4] sm:$0xf0]  ;;  %v1888_v47 = vld [vmem:[#allocation9 + $0x80] sm:$0xf]  ;;  %v2136_v48 = vld [vmem:[#allocation9 + $0x88] sm:$0xf0] }
  0x40   :  { %424 = vmatpush.bf16.msra.mxu2 %v1724_v31  ;;  %771 = vmatpush.bf16.msrb.mxu0 %v1881_v56  ;;  %v1954_v31 = vld [vmem:[#allocation8 + $0x48] sm:$0xf]  ;;  %v2623_v46 = vor.u32 %v2164_v39, %v2004_v45  ;;  %v2161_v49 = vld [vmem:[#allocation8 + $0x94] sm:$0xf]  ;;  %v1942_v52 = vld [vmem:[#allocation8 + $0x30] sm:$0xf]  ;;  %v1889_v54 = vor.u32 %v2136_v48, %v1888_v47 }
  0x41   :  { %453 = vmatpush.bf16.msra.mxu3 %v1728_v32  ;;  %396 = vmatpush.bf16.msra.mxu1 %v1708_v36  ;;  %v2153_v32 = vld [vmem:[#allocation8 + $0x50] sm:$0xf0]  ;;  %v1821_v36 = vor.u32 %v2120_v35, %v1820_v34  ;;  %v2150_v53 = vld [vmem:[#allocation8 + $0x38] sm:$0xf0]  ;;  %v1992_v55 = vld [vmem:[#allocation8 + $0x9c] sm:$0xf0] }
  0x42   :  { %1703 = vmatmul.msk.bf16.gmra.mxu0 %vm196_vm1, %v191_v61  ;;  %v1868_v61 = vld [vmem:[#allocation9 + $0x60] sm:$0xf]  ;;  %v2620_v33 = vor.u32 %v2153_v32, %v1954_v31  ;;  %v2631_v58 = vor.u32 %v2161_v49, %v1992_v55  ;;  %v2131_v59 = vld [vmem:[#allocation9 + $0x64] sm:$0xf]  ;;  %v1980_v10 = vld [vmem:[#allocation8 + $0x84] sm:$0xf0] }
  0x43   :  { %v1869_v63 = vor.u32 %v2132_v62, %v1868_v61  ;;  %v1870_v61 = vld [vmem:[#allocation9 + $0x6c] sm:$0xf0]  ;;  %v2128_v11 = vld [vmem:[#allocation9 + $0x4c] sm:$0xf]  ;;  %v1858_v15 = vld [vmem:[#allocation9 + $0x54] sm:$0xf0] }
  0x44   :  { %425 = vmatpush.bf16.msra.mxu2 %v1712_v40  ;;  %v2134_v40 = vld [vmem:[#allocation9 + $0x7c] sm:$0xf]  ;;  %v2155_v22 = vld [vmem:[#allocation8 + $0x64] sm:$0xf]  ;;  %v1968_v24 = vld [vmem:[#allocation8 + $0x6c] sm:$0xf0] }
  0x45   :  { %454 = vmatpush.bf16.msra.mxu3 %v1716_v41  ;;  %772 = vmatpush.bf16.msrb.mxu0 %v1869_v63  ;;  %v1882_v41 = vld [vmem:[#allocation9 + $0x84] sm:$0xf0]  ;;  %v1873_v63 = vor.u32 %v2131_v59, %v1870_v61  ;;  %v2130_v21 = vld [vmem:[#allocation9 + $0x58] sm:$0xf0]  ;;  %v2125_v25 = vld [vmem:[#allocation9 + $0x34] sm:$0xf] }
  0x46   :  { %v1885_v43 = vor.u32 %v2134_v40, %v1882_v41  ;;  %v1846_v26 = vld [vmem:[#allocation9 + $0x3c] sm:$0xf0]  ;;  %v1852_v35 = vld [vmem:[#allocation9 + $0x38] sm:$0xf]  ;;  %v2152_v37 = vld [vmem:[#allocation8 + $0x4c] sm:$0xf] }
  0x47   :  { %v1849_v32 = vor.u32 %v2125_v25, %v1846_v26  ;;  %v1956_v39 = vld [vmem:[#allocation8 + $0x54] sm:$0xf0]  ;;  %v2122_v40 = vld [vmem:[#allocation9 + $0x1c] sm:$0xf]  ;;  %v2144_v45 = vld [vmem:[#allocation8 + $0x8] sm:$0xf0] }
  0x48   :  { %795 = vmatpush.bf16.msrb.mxu2 %v1913_v28  ;;  %v1930_v28 = vld [vmem:[#allocation8 + $0x18] sm:$0xf]  ;;  %v2655_v41 = vor.u32 %v2152_v37, %v1956_v39  ;;  %v1840_v49 = vld [vmem:[#allocation9 + $0x20] sm:$0xf]  ;;  %v1822_v59 = vld [vmem:[#allocation9 + $0xc] sm:$0xf0] }
  0x49   :  { %1021 = vmatpush.bf16.msrb.mxu3 %v2591_v44  ;;  %773 = vmatpush.bf16.msrb.mxu0 %v1857_v8  ;;  %v1944_v55 = vld [vmem:[#allocation8 + $0x3c] sm:$0xf0]  ;;  %v1920_v39 = vld [vmem:[#allocation8 + $0xc] sm:$0xf0]  ;;  %vm1210_vm13 = vcmp.gt.s32.totalorder %v2580_v6, 1  ;;  %vm1510_vm14 = vcmp.gt.s32.totalorder %v2580_v6, 4 }
  0x4a   :  { %s1686_s19 = sshll.u32 %s2477_s17, 4  ;;  %s1687_s19 = int_to_ptr.vmem [resolvable:$true] %s1686_s19 }
  0x4c   :  { %796 = vmatpush.bf16.msrb.mxu2 %v1901_v42  ;;  %v1834_v42 = vld [vmem:[#allocation9 + $0x24] sm:$0xf0] }
  0x4d   :  { %1022 = vmatpush.bf16.msrb.mxu3 %v2594_v50  ;;  %774 = vmatpush.bf16.msrb.mxu0 %v1845_v17  ;;  %v1861_v17 = vor.u32 %v2128_v11, %v1858_v15  ;;  %v1837_v47 = vor.u32 %v2122_v40, %v1834_v42 }
  0x50   :  { %797 = vmatpush.bf16.msrb.mxu2 %v1889_v54 }
  0x51   :  { %1023 = vmatpush.bf16.msrb.mxu3 %v2597_v60  ;;  %775 = vmatpush.bf16.msrb.mxu0 %v1833_v23 }
  0x52   :  { %1704 = vmatmul.msk.bf16.gmra.mxu0 %vm196_vm1, %v192_v4  ;;  %v1909_v4 = vor.u32 %v2140_v2, %v1906_v3  ;;  %v1876_v2 = vld [vmem:[#allocation9 + $0x68] sm:$0xf]  ;;  %v2133_v3 = vld [vmem:[#allocation9 + $0x70] sm:$0xf0] }
  0x53   :  { %v1877_v8 = vor.u32 %v2133_v3, %v1876_v2  ;;  %v2166_v2 = vld [vmem:[#allocation8 + $0xb8] sm:$0xf0]  ;;  %v1828_v3 = vld [vmem:[#allocation9 + $0x8] sm:$0xf] }
  0x54   :  { %782 = vmatpush.bf16.msrb.mxu1 %v1909_v4  ;;  %v2158_v4 = vld [vmem:[#allocation8 + $0x7c] sm:$0xf] }
  0x55   :  { %1024 = vmatpush.bf16.msrb.mxu3 %v2608_v13  ;;  %776 = vmatpush.bf16.msrb.mxu0 %v1821_v36  ;;  %v2127_v36 = vld [vmem:[#allocation9 + $0x40] sm:$0xf0] }
  0x56   :  { %798 = vmatpush.bf16.msrb.mxu2 %v1877_v8  ;;  %v1853_v38 = vor.u32 %v2127_v36, %v1852_v35 }
  0x58   :  { %783 = vmatpush.bf16.msrb.mxu1 %v1897_v30  ;;  %v2647_v30 = vor.u32 %v2155_v22, %v1968_v24 }
  0x59   :  { %1025 = vmatpush.bf16.msrb.mxu3 %v2620_v33  ;;  %1034 = vmatpush.bf16.msra.mxu0 %v2623_v46 }
  0x5c   :  { %784 = vmatpush.bf16.msrb.mxu1 %v1885_v43  ;;  %v1918_v43 = vld [vmem:[#allocation8] sm:$0xf] }
  0x5d   :  { %1035 = vmatpush.bf16.msra.mxu0 %v2631_v58  ;;  %v2657_v48 = vor.u32 %v2144_v45, %v1918_v43  ;;  %v1986_v45 = vld [vmem:[#allocation8 + $0x80] sm:$0xf] }
  0x60   :  { %785 = vmatpush.bf16.msrb.mxu1 %v1873_v63  ;;  %v2010_v63 = vld [vmem:[#allocation8 + $0xb0] sm:$0xf] }
  0x64   :  { %786 = vmatpush.bf16.msrb.mxu1 %v1861_v17  ;;  %v2146_v17 = vld [vmem:[#allocation8 + $0x1c] sm:$0xf] }
  0x68   :  { %787 = vmatpush.bf16.msrb.mxu1 %v1849_v32 }
  0x6c   :  { %788 = vmatpush.bf16.msrb.mxu1 %v1837_v47  ;;  %v2160_v47 = vld [vmem:[#allocation8 + $0x88] sm:$0xf0] }
  0x98   :  { %v2651_v34 = vpop.permute.xlu0 %2200 }
  0x99   :  { %v2212_v22 = vpop.permute.xlu1 %2211  ;;  %v2203_v24 = vunpack.i.h.bf16 %v2651_v34  ;;  %v2202_v32 = vunpack.i.l.bf16 %v2651_v34 }
  0x9f   :  { %v222_v57 = vpop.f32.mrf.mxu0 }
  0xa0   :  { %v2606_v9 = vadd.f32 %v2602_v1, %v222_v57  ;;  %v2629_v57 = vor.u32 %v2150_v53, %v1942_v52  ;;  %v2124_v52 = vld [vmem:[#allocation9 + $0x28] sm:$0xf0]  ;;  %v2149_v53 = vld [vmem:[#allocation8 + $0x34] sm:$0xf] }
  0xa1   :  { %v1841_v54 = vor.u32 %v2124_v52, %v1840_v49  ;;  %v2664_v8 = vor.u32 %v2149_v53, %v1944_v55  ;;  %v2213_v53 = vunpack.i.l.bf16 %v2212_v22 }
  0xa2   :  { %v242_v18 = vmax.f32 %v2606_v9, 0.0  ;;  %1026 = vmatpush.bf16.msrb.mxu3 %v2629_v57 }
  0xa4   :  { %v584_v49 = vmul.f32 %v2202_v32, %v242_v18 }
  0xa7   :  { %v224_v12 = vpop.f32.mrf.mxu0 }
  0xa8   :  { %v2611_v14 = vadd.f32 %v2602_v1, %v224_v12  ;;  %v2640_v12 = vor.u32 %v2158_v4, %v1980_v10  ;;  %v2121_v10 = vld [vmem:[#allocation9 + $0x10] sm:$0xf0] }
  0xaa   :  { %v243_v19 = vmax.f32 %v2611_v14, 0.0  ;;  %1036 = vmatpush.bf16.msra.mxu0 %v2640_v12 }
  0xac   :  { %v250_v20 = vpack.c.bf16 %v243_v19, %v242_v18  ;;  %v585_v40 = vmul.f32 %v2203_v24, %v243_v19  ;;  %v2217_v19 = vpop.permute.xlu1 %2216  ;;  %v2214_v18 = vunpack.i.h.bf16 %v2212_v22  ;;  %v1950_v24 = vld [vmem:[#allocation8 + $0x38] sm:$0xf] }
  0xae   :  { %397 = vmatmul.bf16.vlgmr.msra.gmra.mxu1 %v250_v20  ;;  %426 = vmatmul.bf16.vlgmr.msra.gmra.mxu2 %v250_v20  ;;  %v592_v55 = vadd.f32 %v585_v40, %v584_v49  ;;  %v1926_v40 = vld [vmem:[#allocation8 + $0x8] sm:$0xf]  ;;  %v1511_v49 = vsel %vm1510_vm14, 1, %v2475_v0 }
  0xaf   :  { %455 = vmatmul.bf16.vlgmr.msra.gmra.mxu3 %v250_v20  ;;  %v227_v29 = vpop.f32.mrf.mxu0  ;;  %v1864_v20 = vld [vmem:[#allocation9 + $0x50] sm:$0xf]  ;;  %1037 = vmatpush.bf16.msra.mxu0 %v2647_v30 }
  0xb0   :  { %v2626_v51 = vadd.f32 %v2602_v1, %v227_v29  ;;  %v1865_v23 = vor.u32 %v2130_v21, %v1864_v20  ;;  %v2147_v29 = vld [vmem:[#allocation8 + $0x20] sm:$0xf0]  ;;  %v1932_v20 = vld [vmem:[#allocation8 + $0x24] sm:$0xf0]  ;;  %v2206_v21 = vpop.permute.xlu0 %2205 }
  0xb1   :  { %v2649_v31 = vor.u32 %v2147_v29, %v1930_v28  ;;  %v2163_v28 = vld [vmem:[#allocation8 + $0xa0] sm:$0xf0]  ;;  %v2676_v29 = vor.u32 %v2146_v17, %v1932_v20  ;;  %v2207_v35 = vunpack.i.l.bf16 %v2206_v21  ;;  %v2208_v42 = vunpack.i.h.bf16 %v2206_v21 }
  0xb2   :  { %v244_v5 = vmax.f32 %v2626_v51, 0.0  ;;  %799 = vmatpush.bf16.msrb.mxu2 %v1865_v23  ;;  %v2670_v23 = vor.u32 %v2166_v2, %v2010_v63  ;;  %v2157_v51 = vld [vmem:[#allocation8 + $0x70] sm:$0xf0]  ;;  %v2218_v63 = vunpack.i.l.bf16 %v2217_v19 }
  0xb3   :  { %1027 = vmatpush.bf16.msrb.mxu3 %v2649_v31  ;;  %1038 = vmatpush.bf16.msra.mxu0 %v2655_v41 }
  0xb4   :  { %v586_v52 = vmul.f32 %v2207_v35, %v244_v5  ;;  %v1938_v35 = vld [vmem:[#allocation8 + $0x20] sm:$0xf] }
  0xb6   :  { %800 = vmatpush.bf16.msrb.mxu2 %v1853_v38  ;;  %v2143_v38 = vld [vmem:[#allocation8 + $0x4] sm:$0xf] }
  0xb7   :  { %v229_v56 = vpop.f32.mrf.mxu0  ;;  %1028 = vmatpush.bf16.msrb.mxu3 %v2657_v48  ;;  %1039 = vmatpush.bf16.msra.mxu0 %v2664_v8  ;;  %v2687_v43 = vor.u32 %v2143_v38, %v1920_v39 }
  0xb8   :  { %v2634_v62 = vadd.f32 %v2602_v1, %v229_v56  ;;  %v2119_v56 = vld [vmem:[#allocation9 + $0x4] sm:$0xf] }
  0xb9   :  { %v1825_v15 = vor.u32 %v2119_v56, %v1822_v59  ;;  %v1974_v56 = vld [vmem:[#allocation8 + $0x68] sm:$0xf] }
  0xba   :  { %v245_v7 = vmax.f32 %v2634_v62, 0.0  ;;  %801 = vmatpush.bf16.msrb.mxu2 %v1841_v54  ;;  %v2696_v54 = vor.u32 %v2160_v47, %v1986_v45  ;;  %v2704_v2 = vor.u32 %v2157_v51, %v1974_v56  ;;  %v1111_v45 = vsel %vm1110_vm12, 1, %v2475_v0 }
  0xbb   :  { %1137 = vmatpush.bf16.msra.mxu3 %v2623_v46  ;;  %789 = vmatpush.bf16.msrb.mxu1 %v1825_v15  ;;  %v2219_v15 = vunpack.i.h.bf16 %v2217_v19  ;;  %v1211_v47 = vsel %vm1210_vm13, 1, %v2475_v0 }
  0xbc   :  { %v251_v16 = vpack.c.bf16 %v245_v7, %v244_v5  ;;  %1040 = vmatpush.bf16.msra.mxu0 %v2676_v29  ;;  %v587_v9 = vmul.f32 %v2208_v42, %v245_v7  ;;  %v593_v5 = vadd.f32 %v592_v55, %v586_v52  ;;  %v1962_v7 = vld [vmem:[#allocation8 + $0x50] sm:$0xf]  ;;  %v2145_v42 = vld [vmem:[#allocation8 + $0x10] sm:$0xf0]  ;;  %1113 = vperm.xlu2 %2220, %v1111_v45   ;;  %v178_v52 = vld [vmem:[%s2904_s5] sm:$0x7] }
  0xbd   :  { %v256_v19 = vperm.slane %v178_v52, 1  ;;  %v257_v55 = vperm.slane %v178_v52, 2 }
  0xbe   :  { %402 = vmatmul.bf16.gmra.mxu1 %v251_v16  ;;  %431 = vmatmul.bf16.gmra.mxu2 %v251_v16 }
  0xbf   :  { %460 = vmatmul.bf16.gmra.mxu3 %v251_v16  ;;  %v232_v27 = vpop.f32.mrf.mxu0  ;;  %v1829_v16 = vor.u32 %v2121_v10, %v1828_v3  ;;  %1047 = vmatpush.bf16.msra.mxu1 %v2670_v23  ;;  %v594_v3 = vadd.f32 %v593_v5, %v587_v9 }
  0xc0   :  { %v2660_v61 = vadd.f32 %v2602_v1, %v232_v27  ;;  %v1998_v27 = vld [vmem:[#allocation8 + $0x98] sm:$0xf]  ;;  %1138 = vmatpush.bf16.msra.mxu3 %v2631_v58  ;;  %1041 = vmatpush.bf16.msra.mxu0 %v2687_v43 }
  0xc1   :  { %802 = vmatpush.bf16.msrb.mxu2 %v1829_v16  ;;  %v2681_v37 = vor.u32 %v2163_v28, %v1998_v27 }
  0xc2   :  { %v246_v25 = vmax.f32 %v2660_v61, 0.0 }
  0xc3   :  { %1048 = vmatpush.bf16.msra.mxu1 %v2681_v37 }
  0xc4   :  { %1139 = vmatpush.bf16.msra.mxu3 %v2640_v12  ;;  %v588_v59 = vmul.f32 %v2213_v53, %v246_v25  ;;  %1213 = vperm.xlu2 %2220, %v1211_v47  }
  0xc5   :  { %1124 = vmatpush.bf16.msra.mxu2 %v2591_v44 }
  0xc7   :  { %v234_v4 = vpop.f32.mrf.mxu0  ;;  %1049 = vmatpush.bf16.msra.mxu1 %v2696_v54 }
  0xc8   :  { %v2668_v11 = vadd.f32 %v2602_v1, %v234_v4  ;;  %1140 = vmatpush.bf16.msra.mxu3 %v2647_v30  ;;  %v2154_v4 = vld [vmem:[#allocation8 + $0x58] sm:$0xf0] }
  0xc9   :  { %1125 = vmatpush.bf16.msra.mxu2 %v2594_v50  ;;  %v2710_v20 = vor.u32 %v2154_v4, %v1962_v7 }
  0xca   :  { %v247_v26 = vmax.f32 %v2668_v11, 0.0  ;;  %v595_v11 = vadd.f32 %v594_v3, %v588_v59 }
  0xcb   :  { %1050 = vmatpush.bf16.msra.mxu1 %v2704_v2 }
  0xcc   :  { %v252_v36 = vpack.c.bf16 %v247_v26, %v246_v25  ;;  %v589_v62 = vmul.f32 %v2214_v18, %v247_v26  ;;  %1141 = vmatpush.bf16.msra.mxu3 %v2655_v41  ;;  %v2151_v25 = vld [vmem:[#allocation8 + $0x40] sm:$0xf0]  ;;  %1513 = vperm.xlu2 %2220, %v1511_v49  }
  0xcd   :  { %1126 = vmatpush.bf16.msra.mxu2 %v2597_v60 }
  0xce   :  { %407 = vmatmul.bf16.gmra.mxu1 %v252_v36  ;;  %436 = vmatmul.bf16.gmra.mxu2 %v252_v36  ;;  %v596_v21 = vadd.f32 %v595_v11, %v589_v62 }
  0xcf   :  { %465 = vmatmul.bf16.gmra.mxu3 %v252_v36  ;;  %v237_v34 = vpop.f32.mrf.mxu0  ;;  %1051 = vmatpush.bf16.msra.mxu1 %v2710_v20  ;;  %v2148_v36 = vld [vmem:[#allocation8 + $0x28] sm:$0xf0] }
  0xd0   :  { %v238_v14 = vadd.f32 %v2602_v1, %v237_v34  ;;  %1142 = vmatpush.bf16.msra.mxu3 %v2664_v8  ;;  %v2720_v39 = vor.u32 %v2148_v36, %v1938_v35  ;;  %v2726_v34 = vor.u32 %v2145_v42, %v1926_v40 }
  0xd1   :  { %1127 = vmatpush.bf16.msra.mxu2 %v2608_v13 }
  0xd2   :  { %v248_v61 = vmax.f32 %v238_v14, 0.0  ;;  %v255_v14 = vperm.slane %v178_v52, 0 }
  0xd4   :  { %v590_v16 = vmul.f32 %v2218_v63, %v248_v61  ;;  %1143 = vmatpush.bf16.msra.mxu3 %v2676_v29 }
  0xd5   :  { %1128 = vmatpush.bf16.msra.mxu2 %v2620_v33 }
  0xd6   :  { %v597_v26 = vadd.f32 %v596_v21, %v590_v16 }
  0xd7   :  { %v239_v10 = vpop.f32.mrf.mxu0 }
  0xd8   :  { %v240_v17 = vadd.f32 %v2602_v1, %v239_v10  ;;  %v2715_v1 = vor.u32 %v2151_v25, %v1950_v24  ;;  %1144 = vmatpush.bf16.msra.mxu3 %v2687_v43 }
  0xd9   :  { %1129 = vmatpush.bf16.msra.mxu2 %v2629_v57 }
  0xda   :  { %v249_v22 = vmax.f32 %v240_v17, 0.0  ;;  %1052 = vmatpush.bf16.msra.mxu1 %v2715_v1 }
  0xdc   :  { %v253_v27 = vpack.c.bf16 %v249_v22, %v248_v61  ;;  %v591_v28 = vmul.f32 %v2219_v15, %v249_v22 }
  0xdd   :  { %1130 = vmatpush.bf16.msra.mxu2 %v2649_v31 }
  0xde   :  { %412 = vmatmul.bf16.gmra.mxu1 %v253_v27  ;;  %441 = vmatmul.bf16.gmra.mxu2 %v253_v27  ;;  %v598_v32 = vadd.f32 %v597_v26, %v591_v28 }
  0xdf   :  { %470 = vmatmul.bf16.gmra.mxu3 %v253_v27  ;;  %1053 = vmatpush.bf16.msra.mxu1 %v2720_v39 }
  0xe0   :  { %v600_v38 = vpack.c.bf16 %v598_v32, %v598_v32 }
  0xe1   :  { %1131 = vmatpush.bf16.msra.mxu2 %v2657_v48 }
  0xe2   :  { %777 = vmatmul.bf16.vlgmr.msrb.gmra.mxu0 %v600_v38 }
  0xe3   :  { %1150 = vmatpush.bf16.msrb.mxu0 %v2670_v23  ;;  %1054 = vmatpush.bf16.msra.mxu1 %v2726_v34 }
  0xe7   :  { %1151 = vmatpush.bf16.msrb.mxu0 %v2681_v37 }
  0xeb   :  { %1152 = vmatpush.bf16.msrb.mxu0 %v2696_v54 }
  0xee   :  { %790 = vmatmul.bf16.vlgmr.msrb.gmra.mxu1 %v600_v38  ;;  %803 = vmatmul.bf16.vlgmr.msrb.gmra.mxu2 %v600_v38 }
  0xef   :  { %1029 = vmatmul.bf16.vlgmr.msrb.gmra.mxu3 %v2475_v0  ;;  %1153 = vmatpush.bf16.msrb.mxu0 %v2704_v2 }
  0xf0   :  { %1224 = vmatpush.bf16.msrb.mxu1 %v2591_v44  ;;  %1237 = vmatpush.bf16.msrb.mxu2 %v2623_v46 }
  0xf1   :  { %1250 = vmatpush.bf16.msrb.mxu3 %v2670_v23 }
  0xf2   :  { %1042 = vmatmul.bf16.vlgmr.msra.gmra.mxu0 %v2475_v0 }
  0xf3   :  { %1154 = vmatpush.bf16.msrb.mxu0 %v2710_v20 }
  0xf4   :  { %1225 = vmatpush.bf16.msrb.mxu1 %v2594_v50  ;;  %1238 = vmatpush.bf16.msrb.mxu2 %v2631_v58 }
  0xf5   :  { %1251 = vmatpush.bf16.msrb.mxu3 %v2681_v37 }
  0xf7   :  { %1155 = vmatpush.bf16.msrb.mxu0 %v2715_v1 }
  0xf8   :  { %1226 = vmatpush.bf16.msrb.mxu1 %v2597_v60  ;;  %1239 = vmatpush.bf16.msrb.mxu2 %v2640_v12 }
  0xf9   :  { %1252 = vmatpush.bf16.msrb.mxu3 %v2696_v54 }
  0xfb   :  { %1156 = vmatpush.bf16.msrb.mxu0 %v2720_v39 }
  0xfc   :  { %1227 = vmatpush.bf16.msrb.mxu1 %v2608_v13  ;;  %1240 = vmatpush.bf16.msrb.mxu2 %v2647_v30 }
  0xfd   :  { %1253 = vmatpush.bf16.msrb.mxu3 %v2704_v2 }
  0xfe   :  { %1055 = vmatmul.bf16.vlgmr.msra.gmra.mxu1 %v2475_v0 }
  0xff   :  { %1157 = vmatpush.bf16.msrb.mxu0 %v2726_v34 }
 0x100   :  { %1228 = vmatpush.bf16.msrb.mxu1 %v2620_v33  ;;  %1241 = vmatpush.bf16.msrb.mxu2 %v2655_v41 }
 0x101   :  { %1254 = vmatpush.bf16.msrb.mxu3 %v2710_v20 }
 0x103   :  { %1324 = vmatpush.bf16.msra.mxu0 %v2591_v44 }
 0x104   :  { %1229 = vmatpush.bf16.msrb.mxu1 %v2629_v57  ;;  %1242 = vmatpush.bf16.msrb.mxu2 %v2664_v8 }
 0x105   :  { %1255 = vmatpush.bf16.msrb.mxu3 %v2715_v1 }
 0x107   :  { %1325 = vmatpush.bf16.msra.mxu0 %v2594_v50 }
 0x108   :  { %1230 = vmatpush.bf16.msrb.mxu1 %v2649_v31  ;;  %1243 = vmatpush.bf16.msrb.mxu2 %v2676_v29 }
 0x109   :  { %1256 = vmatpush.bf16.msrb.mxu3 %v2720_v39 }
 0x10b   :  { %1326 = vmatpush.bf16.msra.mxu0 %v2597_v60 }
 0x10c   :  { %1231 = vmatpush.bf16.msrb.mxu1 %v2657_v48  ;;  %1244 = vmatpush.bf16.msrb.mxu2 %v2687_v43 }
 0x10d   :  { %1257 = vmatpush.bf16.msrb.mxu3 %v2726_v34 }
 0x10f   :  { %1327 = vmatpush.bf16.msra.mxu0 %v2608_v13 }
 0x110   :  { %1337 = vmatpush.bf16.msra.mxu1 %v2623_v46 }
 0x113   :  { %1328 = vmatpush.bf16.msra.mxu0 %v2620_v33 }
 0x114   :  { %1338 = vmatpush.bf16.msra.mxu1 %v2631_v58 }
 0x117   :  { %1329 = vmatpush.bf16.msra.mxu0 %v2629_v57 }
 0x118   :  { %1339 = vmatpush.bf16.msra.mxu1 %v2640_v12 }
 0x11b   :  { %1330 = vmatpush.bf16.msra.mxu0 %v2649_v31 }
 0x11c   :  { %1340 = vmatpush.bf16.msra.mxu1 %v2647_v30 }
 0x11f   :  { %1331 = vmatpush.bf16.msra.mxu0 %v2657_v48 }
 0x120   :  { %1341 = vmatpush.bf16.msra.mxu1 %v2655_v41 }
 0x124   :  { %1342 = vmatpush.bf16.msra.mxu1 %v2664_v8 }
 0x128   :  { %1343 = vmatpush.bf16.msra.mxu1 %v2676_v29 }
 0x12b   :  { %v398_v53 = vpop.f32.mrf.mxu1 }
 0x12c   :  { %1344 = vmatpush.bf16.msra.mxu1 %v2687_v43  ;;  %v399_v18 = vadd.f32 %v398_v53, %v255_v14 }
 0x131   :  { %v427_v9 = vpop.f32.mrf.mxu2 }
 0x132   :  { %v428_v56 = vadd.f32 %v427_v9, %v256_v19  ;;  %v456_v51 = vpop.f32.mrf.mxu3 }
 0x133   :  { %v457_v6 = vadd.f32 %v456_v51, %v257_v55  ;;  %v400_v5 = vpop.f32.mrf.mxu1 }
 0x134   :  { %v2790_v59 = vpack.c.bf16 %v428_v56, %v399_v18  ;;  %v401_v63 = vadd.f32 %v400_v5, %v255_v14 }
 0x135   :  { %v477_v0 = vpack.c.bf16 %v457_v6, %v457_v6  ;;  %v633_v6 = vld [vmem:[%s2908_s9] sm:$0x7] }
 0x137   :  { %496 = vst [vmem:[#allocation2 + $0x8] sm:$0xf] %v477_v0 }
 0x139   :  { %v429_v61 = vpop.f32.mrf.mxu2 }
 0x13a   :  { %v430_v3 = vadd.f32 %v429_v61, %v256_v19  ;;  %v458_v62 = vpop.f32.mrf.mxu3  ;;  %v635_v61 = vperm.slane %v633_v6, 0 }
 0x13b   :  { %v459_v7 = vadd.f32 %v458_v62, %v257_v55  ;;  %v403_v4 = vpop.f32.mrf.mxu1 }
 0x13c   :  { %v2792_v10 = vpack.c.bf16 %v430_v3, %v401_v63  ;;  %v404_v16 = vadd.f32 %v403_v4, %v255_v14  ;;  %v636_v4 = vperm.slane %v633_v6, 1 }
 0x13d   :  { %v479_v11 = vpack.c.bf16 %v459_v7, %v459_v7 }
 0x13f   :  { %498 = vst [vmem:[#allocation2 + $0x14] sm:$0xf] %v479_v11 }
 0x141   :  { %v432_v15 = vpop.f32.mrf.mxu2 }
 0x142   :  { %v433_v17 = vadd.f32 %v432_v15, %v256_v19  ;;  %v461_v21 = vpop.f32.mrf.mxu3 }
 0x143   :  { %v462_v22 = vadd.f32 %v461_v21, %v257_v55  ;;  %v405_v24 = vpop.f32.mrf.mxu1 }
 0x144   :  { %v2794_v25 = vpack.c.bf16 %v433_v17, %v404_v16  ;;  %v406_v28 = vadd.f32 %v405_v24, %v255_v14 }
 0x145   :  { %v481_v26 = vpack.c.bf16 %v462_v22, %v462_v22 }
 0x147   :  { %500 = vst [vmem:[#allocation2 + $0x20] sm:$0xf] %v481_v26  ;;  %v891_v26 = vunpack.c.h.bf16 %v2790_v59 }
 0x149   :  { %v434_v27 = vpop.f32.mrf.mxu2 }
 0x14a   :  { %v435_v32 = vadd.f32 %v434_v27, %v256_v19  ;;  %v463_v35 = vpop.f32.mrf.mxu3 }
 0x14b   :  { %v464_v36 = vadd.f32 %v463_v35, %v257_v55  ;;  %v408_v38 = vpop.f32.mrf.mxu1  ;;  %v890_v35 = vunpack.c.l.bf16 %v2790_v59 }
 0x14c   :  { %v2796_v40 = vpack.c.bf16 %v435_v32, %v406_v28  ;;  %v409_v47 = vadd.f32 %v408_v38, %v255_v14 }
 0x14d   :  { %v483_v42 = vpack.c.bf16 %v464_v36, %v464_v36 }
 0x14f   :  { %502 = vst [vmem:[#allocation2 + $0x2c] sm:$0xf] %v483_v42 }
 0x151   :  { %v437_v45 = vpop.f32.mrf.mxu2 }
 0x152   :  { %v438_v49 = vadd.f32 %v437_v45, %v256_v19  ;;  %v466_v52 = vpop.f32.mrf.mxu3 }
 0x153   :  { %v467_v53 = vadd.f32 %v466_v52, %v257_v55  ;;  %v410_v9 = vpop.f32.mrf.mxu1 }
 0x154   :  { %v2798_v18 = vpack.c.bf16 %v438_v49, %v409_v47 }
 0x155   :  { %v485_v56 = vpack.c.bf16 %v467_v53, %v467_v53 }
 0x157   :  { %504 = vst [vmem:[#allocation2 + $0x38] sm:$0xf] %v485_v56 }
 0x159   :  { %v439_v51 = vpop.f32.mrf.mxu2 }
 0x15a   :  { %v468_v5 = vpop.f32.mrf.mxu3 }
 0x15b   :  { %v413_v0 = vpop.f32.mrf.mxu1 }
 0x15f   :  { %v778_v63 = vpop.f32.mrf.mxu0 }
 0x160   :  { %v779_v3 = vadd.f32 %v778_v63, %v635_v61 }
 0x161   :  { %v442_v62 = vpop.f32.mrf.mxu2 }
 0x162   :  { %v1914_v14 = vmul.f32 -1.442695, %v779_v3  ;;  %v471_v19 = vpop.f32.mrf.mxu3  ;;  %v637_v3 = vperm.slane %v633_v6, 2 }
 0x163   :  { %v415_v7 = vpop.f32.mrf.mxu1 }
 0x164   :  { %2225 = vpow2.f32 %v1914_v14  ;;  %v2222_v14 = vld [vmem:[%s2909_s10] ss:$0 sm:$0xff] }
 0x167   :  { %v780_v55 = vpop.f32.mrf.mxu0 }
 0x169   :  { %v444_v11 = vpop.f32.mrf.mxu2 }
 0x16a   :  { %v2226_v15 = vpop.eup %2225  ;;  %v473_v16 = vpop.f32.mrf.mxu3 }
 0x16b   :  { %v811_v17 = vadd.f32 1.0, %v2226_v15  ;;  %v791_v21 = vpop.f32.mrf.mxu1 }
 0x16c   :  { %v792_v22 = vadd.f32 %v791_v21, %v636_v4 }
 0x16d   :  { %2227 = vrcp.f32 %v811_v17  ;;  %v823_v51 = vand.u32 2147483648, %v811_v17  ;;  %v821_v61 = vand.u32 2147483647, %v811_v17  ;;  %vm817_vm0 = vweird.f32 %v811_v17 }
 0x16e   :  { %v1915_v24 = vmul.f32 -1.442695, %v792_v22 }
 0x16f   :  { %v1043_v27 = vpop.f32.mrf.mxu0  ;;  %v824_v7 = vor.u32 1.1754944e-38, %v823_v51  ;;  %vm822_vm2 = vcmp.eq.f32.partialorder %v821_v61, 8.507059e+37 }
 0x170   :  { %2229 = vpow2.f32 %v1915_v24  ;;  %v1080_v28 = vadd.f32 %v1043_v27, %v891_v26 }
 0x171   :  { %v804_v32 = vpop.f32.mrf.mxu2 }
 0x172   :  { %v2013_v36 = vmul.f32 -1.442695, %v1080_v28  ;;  %v1030_v38 = vpop.f32.mrf.mxu3  ;;  %v805_v21 = vadd.f32 %v804_v32, %v637_v3 }
 0x173   :  { %v2228_v42 = vpop.eup %2227  ;;  %v1060_v45 = vadd.f32 %v1030_v38, %v890_v35  ;;  %v793_v47 = vpop.f32.mrf.mxu1 }
 0x174   :  { %v813_v49 = vmul.f32 %v2228_v42, %v811_v17  ;;  %2231 = vpow2.f32 %v2013_v36  ;;  %vm818_vm15 = vweird.f32 %v2228_v42 }
 0x175   :  { %v2012_v52 = vmul.f32 -1.442695, %v1060_v45  ;;  %vm819_vm1 = vmor %vm817_vm0, %vm818_vm15 }
 0x176   :  { %v2230_v53 = vpop.eup %2229  ;;  %v814_v9 = vsub.f32 1.0, %v813_v49 }
 0x177   :  { %v830_v56 = vadd.f32 1.0, %v2230_v53  ;;  %2233 = vpow2.f32 %v2012_v52  ;;  %v1045_v5 = vpop.f32.mrf.mxu0 }
 0x178   :  { %v815_v0 = vmul.f32 %v2228_v42, %v814_v9  ;;  %v2813_v5 = vld [vmem:[%s2906_s7] ss:$0 sm:$0xff] }
 0x179   :  { %2235 = vrcp.f32 %v830_v56  ;;  %v806_v63 = vpop.f32.mrf.mxu2  ;;  %v842_v28 = vand.u32 2147483648, %v830_v56  ;;  %v840_v38 = vand.u32 2147483647, %v830_v56  ;;  %vm836_vm4 = vweird.f32 %v830_v56 }
 0x17a   :  { %v2232_v59 = vpop.eup %2231  ;;  %v816_v62 = vadd.f32 %v2228_v42, %v815_v0  ;;  %v1032_v19 = vpop.f32.mrf.mxu3 }
 0x17b   :  { %v1056_v55 = vpop.f32.mrf.mxu1  ;;  %v1084_v15 = vadd.f32 1.0, %v2232_v59  ;;  %v843_v32 = vor.u32 1.1754944e-38, %v842_v28  ;;  %vm841_vm6 = vcmp.eq.f32.partialorder %v840_v38, 8.507059e+37  ;;  %v1114_v38 = vpop.permute.xlu2 %1113 }
 0x17c   :  { %v820_v4 = vsel %vm819_vm1, %v2228_v42, %v816_v62  ;;  %vm1115_vm15 = vcmp.eq.s32.totalorder %v1114_v38, 1 }
 0x17d   :  { %v2234_v11 = vpop.eup %2233  ;;  %v825_v16 = vsel %vm822_vm2, %v824_v7, %v820_v4  ;;  %v889_v7 = vld [vmem:[#allocation2 + $0x8] sm:$0xf]  ;;  %vm1090_vm12 = vweird.f32 %v1084_v15  ;;  %v1094_v28 = vand.u32 2147483647, %v1084_v15  ;;  %vm2014_vm0 = vmpackc.low %vm1115_vm15, %vm1115_vm15 }
 0x17e   :  { %v850_v22 = vmul.f32 %v2222_v14, %v825_v16  ;;  %v1064_v24 = vadd.f32 1.0, %v2234_v11  ;;  %v1103_v14 = vadd.f32 %v2813_v5, %v1056_v55 }
 0x17f   :  { %v2236_v26 = vpop.eup %2235  ;;  %vm1095_vm14 = vcmp.eq.f32.partialorder %v1094_v28, 8.507059e+37 }
 0x180   :  { %v832_v6 = vmul.f32 %v2236_v26, %v830_v56  ;;  %v851_v27 = vadd.f32 %v850_v22, %v805_v21  ;;  %2237 = vrcp.f32 %v1064_v24  ;;  %vm837_vm3 = vweird.f32 %v2236_v26 }
 0x181   :  { %2239 = vrcp.f32 %v1084_v15  ;;  %vm838_vm5 = vmor %vm836_vm4, %vm837_vm3  ;;  %v1076_v56 = vand.u32 2147483648, %v1064_v24  ;;  %v1074_v59 = vand.u32 2147483647, %v1064_v24  ;;  %vm1070_vm8 = vweird.f32 %v1064_v24 }
 0x182   :  { %v833_v17 = vsub.f32 1.0, %v832_v6  ;;  %2241 = vtanh.f32 %v851_v27  ;;  %v892_v21 = vunpack.c.l.bf16 %v889_v7 }
 0x183   :  { %v1058_v35 = vpop.f32.mrf.mxu1  ;;  %v1077_v4 = vor.u32 1.1754944e-38, %v1076_v56  ;;  %vm1075_vm10 = vcmp.eq.f32.partialorder %v1074_v59, 8.507059e+37 }
 0x184   :  { %v834_v36 = vmul.f32 %v2236_v26, %v833_v17  ;;  %v1096_v17 = vand.u32 2147483648, %v1084_v15 }
 0x186   :  { %v2238_v42 = vpop.eup %2237  ;;  %v835_v45 = vadd.f32 %v2236_v26, %v834_v36  ;;  %v1097_v35 = vor.u32 1.1754944e-38, %v1096_v17 }
 0x187   :  { %v2240_v47 = vpop.eup %2239  ;;  %v1066_v49 = vmul.f32 %v2238_v42, %v1064_v24  ;;  %vm1071_vm7 = vweird.f32 %v2238_v42 }
 0x188   :  { %v2808_v52 = vpop.eup %2241  ;;  %v839_v53 = vsel %vm838_vm5, %v2236_v26, %v835_v45  ;;  %v1086_v0 = vmul.f32 %v2240_v47, %v1084_v15  ;;  %vm1072_vm9 = vmor %vm1070_vm8, %vm1071_vm7  ;;  %vm1091_vm11 = vweird.f32 %v2240_v47 }
 0x189   :  { %v844_v9 = vsel %vm841_vm6, %v843_v32, %v839_v53  ;;  %v1067_v51 = vsub.f32 1.0, %v1066_v49  ;;  %vm1092_vm13 = vmor %vm1090_vm12, %vm1091_vm11 }
 0x18a   :  { %v2816_v61 = vmul.f32 %v2808_v52, %v844_v9  ;;  %v1087_v19 = vsub.f32 1.0, %v1086_v0 }
 0x18b   :  { %v1068_v63 = vmul.f32 %v2238_v42, %v1067_v51 }
 0x18c   :  { %v854_v3 = vsub.f32 %v2808_v52, %v2816_v61  ;;  %v1088_v26 = vmul.f32 %v2240_v47, %v1087_v19 }
 0x18d   :  { %v1069_v62 = vadd.f32 %v2238_v42, %v1068_v63 }
 0x18e   :  { %v1089_v27 = vadd.f32 %v2240_v47, %v1088_v26 }
 0x18f   :  { %v1073_v11 = vsel %vm1072_vm9, %v2238_v42, %v1069_v62  ;;  %v1119_v62 = vld [vmem:[#allocation2 + $0x14] sm:$0xf] }
 0x190   :  { %v1078_v16 = vsel %vm1075_vm10, %v1077_v4, %v1073_v11  ;;  %v1093_v24 = vsel %vm1092_vm13, %v2240_v47, %v1089_v27 }
 0x191   :  { %v1104_v22 = vmul.f32 %v1103_v14, %v1078_v16  ;;  %v1098_v42 = vsel %vm1095_vm14, %v1097_v35, %v1093_v24  ;;  %v1122_v16 = vunpack.c.l.bf16 %v1119_v62 }
 0x193   :  { %v1105_v6 = vadd.f32 %v1104_v22, %v892_v21 }
 0x195   :  { %2243 = vtanh.f32 %v1105_v6 }
 0x19b   :  { %v2244_v55 = vpop.eup %2243 }
 0x19c   :  { %v1107_v36 = vsub.f32 0.0, %v2244_v55 }
 0x19e   :  { %v1108_v45 = vmul.f32 %v1107_v36, %v1098_v42  ;;  %v1214_v42 = vpop.permute.xlu2 %1213 }
 0x19f   :  { %vm1215_vm9 = vcmp.eq.s32.totalorder %v1214_v42, 1 }
 0x1a0   :  { %v1109_v32 = vadd.f32 %v2244_v55, %v1108_v45 }
 0x1a2   :  { %v2821_v49 = vsel %vm1115_vm15, %v1109_v32, 0.0  ;;  %v2015_v53 = vpack.c.bf16 %v1109_v32, %v1109_v32 }
 0x1a4   :  { %2016 = vmatmul.msk.bf16.vlgmr.msra.gmra.mxu2 %vm2014_vm0, %v2015_v53  ;;  %2019 = vmatmul.msk.bf16.vlgmr.msra.gmra.mxu3 %vm2014_vm0, %v2015_v53 }
 0x1a5   :  { %2022 = vmatmul.msk.bf16.vlgmr.msrb.gmra.mxu0 %vm2014_vm0, %v2015_v53  ;;  %1350 = vmatpush.bf16.msra.mxu2 %v2670_v23 }
 0x1a6   :  { %1424 = vmatpush.bf16.msra.mxu3 %v2591_v44  ;;  %1437 = vmatpush.bf16.msrb.mxu0 %v2623_v46 }
 0x1a9   :  { %1351 = vmatpush.bf16.msra.mxu2 %v2681_v37 }
 0x1aa   :  { %1425 = vmatpush.bf16.msra.mxu3 %v2594_v50  ;;  %1438 = vmatpush.bf16.msrb.mxu0 %v2631_v58  ;;  %v1120_v50 = vunpack.c.l.bf16 %v2792_v10 }
 0x1ad   :  { %1352 = vmatpush.bf16.msra.mxu2 %v2696_v54 }
 0x1ae   :  { %1426 = vmatpush.bf16.msra.mxu3 %v2597_v60  ;;  %1439 = vmatpush.bf16.msrb.mxu0 %v2640_v12  ;;  %v1121_v60 = vunpack.c.h.bf16 %v2792_v10 }
 0x1b1   :  { %1353 = vmatpush.bf16.msra.mxu2 %v2704_v2 }
 0x1b2   :  { %1427 = vmatpush.bf16.msra.mxu3 %v2608_v13  ;;  %1440 = vmatpush.bf16.msrb.mxu0 %v2647_v30 }
 0x1b5   :  { %1354 = vmatpush.bf16.msra.mxu2 %v2710_v20 }
 0x1b6   :  { %1428 = vmatpush.bf16.msra.mxu3 %v2620_v33  ;;  %1441 = vmatpush.bf16.msrb.mxu0 %v2655_v41 }
 0x1b9   :  { %1355 = vmatpush.bf16.msra.mxu2 %v2715_v1 }
 0x1ba   :  { %1429 = vmatpush.bf16.msra.mxu3 %v2629_v57  ;;  %1442 = vmatpush.bf16.msrb.mxu0 %v2664_v8 }
 0x1bd   :  { %1356 = vmatpush.bf16.msra.mxu2 %v2720_v39 }
 0x1be   :  { %1430 = vmatpush.bf16.msra.mxu3 %v2649_v31  ;;  %1443 = vmatpush.bf16.msrb.mxu0 %v2676_v29 }
 0x1c1   :  { %1357 = vmatpush.bf16.msra.mxu2 %v2726_v34 }
 0x1c2   :  { %1431 = vmatpush.bf16.msra.mxu3 %v2657_v48  ;;  %1444 = vmatpush.bf16.msrb.mxu0 %v2687_v43 }
 0x222   :  { %v1159_v44 = vpop.f32.mrf.mxu0 }
 0x223   :  { %v1203_v7 = vadd.f32 %v2813_v5, %v1159_v44 }
 0x227   :  { %v1133_v13 = vpop.f32.mrf.mxu2  ;;  %v1146_v33 = vpop.f32.mrf.mxu3 }
 0x228   :  { %v1163_v46 = vadd.f32 %v1133_v13, %v1120_v50  ;;  %v1183_v57 = vadd.f32 %v1146_v33, %v1121_v60 }
 0x22a   :  { %v2023_v58 = vmul.f32 -1.442695, %v1163_v46  ;;  %v2024_v12 = vmul.f32 -1.442695, %v1183_v57  ;;  %v1161_v30 = vpop.f32.mrf.mxu0 }
 0x22c   :  { %2245 = vpow2.f32 %v2023_v58  ;;  %v2179_v58 = vld [vmem:[#allocation12 + $0x20] sm:$0xff] }
 0x22d   :  { %2247 = vpow2.f32 %v2024_v12 }
 0x22f   :  { %v1135_v31 = vpop.f32.mrf.mxu2  ;;  %v1148_v41 = vpop.f32.mrf.mxu3 }
 0x230   :  { %v2178_v31 = vld [vmem:[#allocation12 + $0x18] sm:$0xff] }
 0x232   :  { %v2246_v8 = vpop.eup %2245 }
 0x233   :  { %v2248_v48 = vpop.eup %2247  ;;  %v1167_v29 = vadd.f32 1.0, %v2246_v8 }
 0x234   :  { %v1187_v43 = vadd.f32 1.0, %v2248_v48  ;;  %v2177_v48 = vld [vmem:[#allocation12 + $0x10] sm:$0xff] }
 0x235   :  { %2249 = vrcp.f32 %v1167_v29  ;;  %v1179_v51 = vand.u32 2147483648, %v1167_v29  ;;  %v1177_v63 = vand.u32 2147483647, %v1167_v29  ;;  %vm1173_vm2 = vweird.f32 %v1167_v29 }
 0x236   :  { %2251 = vrcp.f32 %v1187_v43  ;;  %v1199_v27 = vand.u32 2147483648, %v1187_v43  ;;  %vm1193_vm6 = vweird.f32 %v1187_v43  ;;  %v1197_v17 = vand.u32 2147483647, %v1187_v43 }
 0x237   :  { %v1180_v14 = vor.u32 1.1754944e-38, %v1179_v51  ;;  %vm1178_vm4 = vcmp.eq.f32.partialorder %v1177_v63, 8.507059e+37 }
 0x238   :  { %v1200_v55 = vor.u32 1.1754944e-38, %v1199_v27  ;;  %vm1198_vm8 = vcmp.eq.f32.partialorder %v1197_v17, 8.507059e+37 }
 0x23b   :  { %v2250_v15 = vpop.eup %2249 }
 0x23c   :  { %v2252_v47 = vpop.eup %2251  ;;  %v1169_v10 = vmul.f32 %v2250_v15, %v1167_v29  ;;  %vm1174_vm1 = vweird.f32 %v2250_v15 }
 0x23d   :  { %v1189_v0 = vmul.f32 %v2252_v47, %v1187_v43  ;;  %vm1175_vm3 = vmor %vm1173_vm2, %vm1174_vm1  ;;  %vm1194_vm5 = vweird.f32 %v2252_v47 }
 0x23e   :  { %v1170_v9 = vsub.f32 1.0, %v1169_v10  ;;  %vm1195_vm7 = vmor %vm1193_vm6, %vm1194_vm5  ;;  %v2176_v10 = vld [vmem:[#allocation12 + $0x8] sm:$0xff] }
 0x23f   :  { %v1190_v19 = vsub.f32 1.0, %v1189_v0 }
 0x240   :  { %v1171_v56 = vmul.f32 %v2250_v15, %v1170_v9 }
 0x241   :  { %v1191_v22 = vmul.f32 %v2252_v47, %v1190_v19  ;;  %v2175_v19 = vld [vmem:[#allocation12] sm:$0xff] }
 0x242   :  { %v1172_v59 = vadd.f32 %v2250_v15, %v1171_v56  ;;  %v1219_v56 = vld [vmem:[#allocation2 + $0x20] sm:$0xf] }
 0x243   :  { %v1192_v6 = vadd.f32 %v2252_v47, %v1191_v22 }
 0x244   :  { %v1176_v4 = vsel %vm1175_vm3, %v2250_v15, %v1172_v59 }
 0x245   :  { %v1181_v11 = vsel %vm1178_vm4, %v1180_v14, %v1176_v4  ;;  %v1196_v28 = vsel %vm1195_vm7, %v2252_v47, %v1192_v6  ;;  %v1222_v4 = vunpack.c.l.bf16 %v1219_v56 }
 0x246   :  { %v1204_v21 = vmul.f32 %v1203_v7, %v1181_v11  ;;  %v1201_v36 = vsel %vm1198_vm8, %v1200_v55, %v1196_v28 }
 0x248   :  { %v1205_v26 = vadd.f32 %v1204_v21, %v1122_v16 }
 0x24a   :  { %2253 = vtanh.f32 %v1205_v26 }
 0x250   :  { %v2254_v24 = vpop.eup %2253 }
 0x251   :  { %v1207_v35 = vsub.f32 %v2821_v49, %v2254_v24 }
 0x253   :  { %v1208_v38 = vmul.f32 %v1207_v35, %v1201_v36  ;;  %v1314_v35 = vpop.permute.xlu0 %1313 }
 0x254   :  { %vm1315_vm2 = vcmp.eq.s32.totalorder %v1314_v35, 1 }
 0x255   :  { %v1209_v45 = vadd.f32 %v2254_v24, %v1208_v38 }
 0x257   :  { %v2852_v32 = vsel %vm1215_vm9, %v1209_v45, %v2821_v49  ;;  %v1220_v49 = vunpack.c.l.bf16 %v2794_v25 }
 0x258   :  { %v1223_v53 = vpack.c.bf16 %v2852_v32, %v2852_v32 }
 0x25a   :  { %1232 = vmatmul.bf16.vlgmr.msrb.gmra.mxu1 %v1223_v53  ;;  %1245 = vmatmul.bf16.vlgmr.msrb.gmra.mxu2 %v1223_v53 }
 0x25b   :  { %1258 = vmatmul.bf16.vlgmr.msrb.gmra.mxu3 %v1223_v53  ;;  %1450 = vmatpush.bf16.msrb.mxu1 %v2670_v23  ;;  %v2182_v23 = vld [vmem:[#allocation12 + $0x38] sm:$0xff]  ;;  %v1519_v53 = vmax.f32 %v854_v3, 0.0 }
 0x25c   :  { %1601 = vmatpush.bf16.msrb.mxu2 %v2182_v23 }
 0x25f   :  { %1451 = vmatpush.bf16.msrb.mxu1 %v2681_v37  ;;  %v1221_v37 = vunpack.c.h.bf16 %v2794_v25 }
 0x263   :  { %1452 = vmatpush.bf16.msrb.mxu1 %v2696_v54 }
 0x267   :  { %1453 = vmatpush.bf16.msrb.mxu1 %v2704_v2 }
 0x26b   :  { %1454 = vmatpush.bf16.msrb.mxu1 %v2710_v20  ;;  %v2181_v20 = vld [vmem:[#allocation12 + $0x30] sm:$0xff] }
 0x26c   :  { %1602 = vmatpush.bf16.msrb.mxu2 %v2181_v20 }
 0x26f   :  { %1455 = vmatpush.bf16.msrb.mxu1 %v2715_v1 }
 0x273   :  { %1456 = vmatpush.bf16.msrb.mxu1 %v2720_v39 }
 0x277   :  { %1457 = vmatpush.bf16.msrb.mxu1 %v2726_v34  ;;  %v2180_v34 = vld [vmem:[#allocation12 + $0x28] sm:$0xff] }
 0x278   :  { %1603 = vmatpush.bf16.msrb.mxu2 %v2180_v34 }
 0x27c   :  { %1604 = vmatpush.bf16.msrb.mxu2 %v2179_v58 }
 0x280   :  { %1605 = vmatpush.bf16.msrb.mxu2 %v2178_v31 }
 0x284   :  { %1606 = vmatpush.bf16.msrb.mxu2 %v2177_v48  ;;  %v1319_v48 = vld [vmem:[#allocation2 + $0x2c] sm:$0xf] }
 0x288   :  { %1607 = vmatpush.bf16.msrb.mxu2 %v2176_v10  ;;  %v1322_v10 = vunpack.c.l.bf16 %v1319_v48 }
 0x28c   :  { %1608 = vmatpush.bf16.msrb.mxu2 %v2175_v19 }
 0x2d7   :  { %v1233_v44 = vpop.f32.mrf.mxu1 }
 0x2d8   :  { %v1263_v50 = vadd.f32 %v1233_v44, %v1220_v49  ;;  %v1520_v49 = vpack.c.bf16 %v1519_v53, %v1519_v53  ;;  %v1320_v44 = vunpack.c.l.bf16 %v2796_v40 }
 0x2da   :  { %v2025_v60 = vmul.f32 -1.442695, %v1263_v50  ;;  %v1321_v50 = vunpack.c.h.bf16 %v2796_v40 }
 0x2dc   :  { %2255 = vpow2.f32 %v2025_v60 }
 0x2dd   :  { %v1246_v54 = vpop.f32.mrf.mxu2 }
 0x2de   :  { %v1283_v2 = vadd.f32 %v1246_v54, %v1221_v37  ;;  %v1259_v13 = vpop.f32.mrf.mxu3 }
 0x2df   :  { %v1235_v33 = vpop.f32.mrf.mxu1  ;;  %v1303_v14 = vadd.f32 %v2813_v5, %v1259_v13 }
 0x2e0   :  { %v2026_v1 = vmul.f32 -1.442695, %v1283_v2 }
 0x2e2   :  { %v2256_v39 = vpop.eup %2255  ;;  %2257 = vpow2.f32 %v2026_v1 }
 0x2e3   :  { %v1267_v46 = vadd.f32 1.0, %v2256_v39 }
 0x2e5   :  { %2259 = vrcp.f32 %v1267_v46  ;;  %v1248_v57 = vpop.f32.mrf.mxu2  ;;  %v1279_v43 = vand.u32 2147483648, %v1267_v46  ;;  %v1277_v47 = vand.u32 2147483647, %v1267_v46  ;;  %vm1273_vm11 = vweird.f32 %v1267_v46 }
 0x2e6   :  { %v1261_v12 = vpop.f32.mrf.mxu3 }
 0x2e7   :  { %v1280_v63 = vor.u32 1.1754944e-38, %v1279_v43  ;;  %vm1278_vm13 = vcmp.eq.f32.partialorder %v1277_v47, 8.507059e+37 }
 0x2e8   :  { %v2258_v30 = vpop.eup %2257 }
 0x2e9   :  { %v1287_v25 = vadd.f32 1.0, %v2258_v30 }
 0x2eb   :  { %v2260_v41 = vpop.eup %2259  ;;  %2261 = vrcp.f32 %v1287_v25  ;;  %v1299_v26 = vand.u32 2147483648, %v1287_v25  ;;  %vm1293_vm15 = vweird.f32 %v1287_v25  ;;  %v1297_v6 = vand.u32 2147483647, %v1287_v25 }
 0x2ec   :  { %v1269_v8 = vmul.f32 %v2260_v41, %v1267_v46  ;;  %vm1274_vm10 = vweird.f32 %v2260_v41 }
 0x2ed   :  { %vm1275_vm12 = vmor %vm1273_vm11, %vm1274_vm10  ;;  %v1300_v28 = vor.u32 1.1754944e-38, %v1299_v26  ;;  %vm1298_vm1 = vcmp.eq.f32.partialorder %v1297_v6, 8.507059e+37 }
 0x2ee   :  { %v1270_v29 = vsub.f32 1.0, %v1269_v8 }
 0x2f0   :  { %v1271_v15 = vmul.f32 %v2260_v41, %v1270_v29 }
 0x2f1   :  { %v2262_v9 = vpop.eup %2261 }
 0x2f2   :  { %v1289_v51 = vmul.f32 %v2262_v9, %v1287_v25  ;;  %v1272_v0 = vadd.f32 %v2260_v41, %v1271_v15  ;;  %vm1294_vm14 = vweird.f32 %v2262_v9 }
 0x2f3   :  { %vm1295_vm0 = vmor %vm1293_vm15, %vm1294_vm14 }
 0x2f4   :  { %v1290_v59 = vsub.f32 1.0, %v1289_v51  ;;  %v1276_v62 = vsel %vm1275_vm12, %v2260_v41, %v1272_v0 }
 0x2f5   :  { %v1281_v7 = vsel %vm1278_vm13, %v1280_v63, %v1276_v62 }
 0x2f6   :  { %v1304_v11 = vmul.f32 %v1303_v14, %v1281_v7  ;;  %v1291_v16 = vmul.f32 %v2262_v9, %v1290_v59 }
 0x2f8   :  { %v1305_v21 = vadd.f32 %v1304_v11, %v1222_v4  ;;  %v1292_v22 = vadd.f32 %v2262_v9, %v1291_v16  ;;  %v1414_v16 = vpop.permute.xlu1 %1413 }
 0x2f9   :  { %vm1415_vm11 = vcmp.eq.s32.totalorder %v1414_v16, 1 }
 0x2fa   :  { %2263 = vtanh.f32 %v1305_v21  ;;  %v1296_v27 = vsel %vm1295_vm0, %v2262_v9, %v1292_v22 }
 0x2fb   :  { %v1301_v55 = vsel %vm1298_vm1, %v1300_v28, %v1296_v27  ;;  %v2174_v27 = vld [vmem:[#allocation11 + $0x38] sm:$0xff]  ;;  %v2173_v28 = vld [vmem:[#allocation11 + $0x30] sm:$0xff] }
 0x2fc   :  { %1662 = vmatpush.bf16.msrb.mxu3 %v2174_v27 }
 0x300   :  { %v2264_v17 = vpop.eup %2263  ;;  %1663 = vmatpush.bf16.msrb.mxu3 %v2173_v28 }
 0x301   :  { %v1307_v24 = vsub.f32 %v2852_v32, %v2264_v17 }
 0x303   :  { %v1308_v36 = vmul.f32 %v1307_v24, %v1301_v55 }
 0x305   :  { %v1309_v38 = vadd.f32 %v2264_v17, %v1308_v36  ;;  %v1421_v17 = vunpack.c.h.bf16 %v2798_v18  ;;  %v2172_v36 = vld [vmem:[#allocation11 + $0x28] sm:$0xff] }
 0x306   :  { %1664 = vmatpush.bf16.msrb.mxu3 %v2172_v36 }
 0x307   :  { %v2869_v42 = vsel %vm1315_vm2, %v1309_v38, %v2852_v32 }
 0x308   :  { %v1323_v45 = vpack.c.bf16 %v2869_v42, %v2869_v42 }
 0x30a   :  { %1332 = vmatmul.bf16.vlgmr.msra.gmra.mxu0 %v1323_v45  ;;  %1345 = vmatmul.bf16.vlgmr.msra.gmra.mxu1 %v1323_v45 }
 0x30b   :  { %1358 = vmatmul.bf16.vlgmr.msra.gmra.mxu2 %v1323_v45  ;;  %v2171_v45 = vld [vmem:[#allocation11 + $0x20] sm:$0xff] }
 0x30c   :  { %1665 = vmatpush.bf16.msrb.mxu3 %v2171_v45 }
 0x31b   :  { %1609 = vmatmul.bf16.vlgmr.msrb.gmra.mxu2 %v1520_v49 }
 0x387   :  { %v1333_v60 = vpop.f32.mrf.mxu0  ;;  %v1346_v23 = vpop.f32.mrf.mxu1 }
 0x388   :  { %v1363_v32 = vadd.f32 %v1333_v60, %v1320_v44  ;;  %v1383_v37 = vadd.f32 %v1346_v23, %v1321_v50  ;;  %v2170_v23 = vld [vmem:[#allocation11 + $0x18] sm:$0xff] }
 0x389   :  { %1666 = vmatpush.bf16.msrb.mxu3 %v2170_v23 }
 0x38a   :  { %v2027_v54 = vmul.f32 -1.442695, %v1363_v32  ;;  %v2028_v2 = vmul.f32 -1.442695, %v1383_v37  ;;  %v2169_v32 = vld [vmem:[#allocation11 + $0x10] sm:$0xff] }
 0x38c   :  { %2265 = vpow2.f32 %v2027_v54 }
 0x38d   :  { %2267 = vpow2.f32 %v2028_v2  ;;  %1667 = vmatpush.bf16.msrb.mxu3 %v2169_v32 }
 0x38e   :  { %v1359_v13 = vpop.f32.mrf.mxu2 }
 0x38f   :  { %v1335_v20 = vpop.f32.mrf.mxu0  ;;  %v1348_v33 = vpop.f32.mrf.mxu1  ;;  %v1403_v15 = vadd.f32 %v2813_v5, %v1359_v13 }
 0x390   :  { %v2168_v20 = vld [vmem:[#allocation11 + $0x8] sm:$0xff]  ;;  %v2167_v33 = vld [vmem:[#allocation11] sm:$0xff] }
 0x391   :  { %1668 = vmatpush.bf16.msrb.mxu3 %v2168_v20 }
 0x392   :  { %v2266_v1 = vpop.eup %2265 }
 0x393   :  { %v2268_v52 = vpop.eup %2267  ;;  %v1367_v61 = vadd.f32 1.0, %v2266_v1 }
 0x394   :  { %v1387_v3 = vadd.f32 1.0, %v2268_v52 }
 0x395   :  { %2269 = vrcp.f32 %v1367_v61  ;;  %v1379_v30 = vand.u32 2147483648, %v1367_v61  ;;  %v1377_v31 = vand.u32 2147483647, %v1367_v61  ;;  %vm1373_vm4 = vweird.f32 %v1367_v61  ;;  %1669 = vmatpush.bf16.msrb.mxu3 %v2167_v33 }
 0x396   :  { %2271 = vrcp.f32 %v1387_v3  ;;  %v1361_v39 = vpop.f32.mrf.mxu2  ;;  %v1399_v59 = vand.u32 2147483648, %v1387_v3  ;;  %vm1393_vm8 = vweird.f32 %v1387_v3  ;;  %v1397_v62 = vand.u32 2147483647, %v1387_v3 }
 0x397   :  { %v1380_v29 = vor.u32 1.1754944e-38, %v1379_v30  ;;  %vm1378_vm6 = vcmp.eq.f32.partialorder %v1377_v31, 8.507059e+37 }
 0x398   :  { %v1400_v7 = vor.u32 1.1754944e-38, %v1399_v59  ;;  %vm1398_vm10 = vcmp.eq.f32.partialorder %v1397_v62, 8.507059e+37  ;;  %v1514_v59 = vpop.permute.xlu2 %1513 }
 0x39b   :  { %v2270_v34 = vpop.eup %2269 }
 0x39c   :  { %v2272_v40 = vpop.eup %2271  ;;  %v1369_v46 = vmul.f32 %v2270_v34, %v1367_v61  ;;  %vm1374_vm3 = vweird.f32 %v2270_v34 }
 0x39d   :  { %v1389_v12 = vmul.f32 %v2272_v40, %v1387_v3  ;;  %vm1375_vm5 = vmor %vm1373_vm4, %vm1374_vm3  ;;  %vm1394_vm7 = vweird.f32 %v2272_v40  ;;  %vm1515_vm4 = vcmp.eq.s32.totalorder %v1514_v59, 1 }
 0x39e   :  { %v1370_v57 = vsub.f32 1.0, %v1369_v46  ;;  %v2878_v58 = vpop.f32.mrf.mxu2  ;;  %vm1395_vm9 = vmor %vm1393_vm8, %vm1394_vm7 }
 0x39f   :  { %v1390_v8 = vsub.f32 1.0, %v1389_v12 }
 0x3a0   :  { %v1371_v25 = vmul.f32 %v2270_v34, %v1370_v57 }
 0x3a1   :  { %v1391_v0 = vmul.f32 %v2272_v40, %v1390_v8 }
 0x3a2   :  { %v1372_v41 = vadd.f32 %v2270_v34, %v1371_v25  ;;  %v1419_v25 = vld [vmem:[#allocation2 + $0x38] sm:$0xf] }
 0x3a3   :  { %v1392_v63 = vadd.f32 %v2272_v40, %v1391_v0 }
 0x3a4   :  { %v1376_v43 = vsel %vm1375_vm5, %v2270_v34, %v1372_v41 }
 0x3a5   :  { %v1381_v47 = vsel %vm1378_vm6, %v1380_v29, %v1376_v43  ;;  %v1396_v14 = vsel %vm1395_vm9, %v2272_v40, %v1392_v63  ;;  %v1422_v29 = vunpack.c.l.bf16 %v1419_v25 }
 0x3a6   :  { %v1404_v9 = vmul.f32 %v1403_v15, %v1381_v47  ;;  %v1612_v51 = vpop.f32.mrf.mxu2  ;;  %v1401_v11 = vsel %vm1398_vm10, %v1400_v7, %v1396_v14 }
 0x3a8   :  { %v1405_v56 = vadd.f32 %v1404_v9, %v1322_v10 }
 0x3aa   :  { %2273 = vtanh.f32 %v1405_v56 }
 0x3b0   :  { %v2274_v19 = vpop.eup %2273 }
 0x3b1   :  { %v1407_v4 = vsub.f32 %v2869_v42, %v2274_v19 }
 0x3b3   :  { %v1408_v21 = vmul.f32 %v1407_v4, %v1401_v11  ;;  %v2224_v11 = vld [vmem:[%s2912_s13] ss:$0 sm:$0xff] }
 0x3b5   :  { %v1409_v22 = vadd.f32 %v2274_v19, %v1408_v21 }
 0x3b7   :  { %v2883_v26 = vsel %vm1415_vm11, %v1409_v22, %v2869_v42  ;;  %v1420_v42 = vunpack.c.l.bf16 %v2798_v18 }
 0x3b8   :  { %v1423_v6 = vpack.c.bf16 %v2883_v26, %v2883_v26 }
 0x3ba   :  { %1432 = vmatmul.bf16.vlgmr.msra.gmra.mxu3 %v1423_v6  ;;  %1445 = vmatmul.bf16.vlgmr.msrb.gmra.mxu0 %v1423_v6 }
 0x3bb   :  { %1458 = vmatmul.bf16.vlgmr.msrb.gmra.mxu1 %v1423_v6 }
 0x437   :  { %v1446_v24 = vpop.f32.mrf.mxu0 }
 0x438   :  { %v1483_v55 = vadd.f32 %v1446_v24, %v1421_v17  ;;  %v1459_v35 = vpop.f32.mrf.mxu1 }
 0x439   :  { %v1503_v31 = vadd.f32 %v2813_v5, %v1459_v35 }
 0x43a   :  { %v2030_v38 = vmul.f32 -1.442695, %v1483_v55 }
 0x43c   :  { %2275 = vpow2.f32 %v2030_v38 }
 0x43d   :  { %v1433_v53 = vpop.f32.mrf.mxu3 }
 0x43e   :  { %v1463_v49 = vadd.f32 %v1433_v53, %v1420_v42 }
 0x43f   :  { %v1448_v44 = vpop.f32.mrf.mxu0 }
 0x440   :  { %v2029_v50 = vmul.f32 -1.442695, %v1463_v49  ;;  %v1461_v60 = vpop.f32.mrf.mxu1 }
 0x442   :  { %2277 = vpow2.f32 %v2029_v50  ;;  %v2276_v37 = vpop.eup %2275 }
 0x443   :  { %v1487_v13 = vadd.f32 1.0, %v2276_v37 }
 0x445   :  { %v1435_v54 = vpop.f32.mrf.mxu3  ;;  %v1499_v10 = vand.u32 2147483648, %v1487_v13  ;;  %vm1493_vm1 = vweird.f32 %v1487_v13  ;;  %v1497_v9 = vand.u32 2147483647, %v1487_v13 }
 0x447   :  { %v1500_v56 = vor.u32 1.1754944e-38, %v1499_v10  ;;  %vm1498_vm3 = vcmp.eq.f32.partialorder %v1497_v9, 8.507059e+37 }
 0x448   :  { %v2278_v2 = vpop.eup %2277 }
 0x449   :  { %v1467_v18 = vadd.f32 1.0, %v2278_v2 }
 0x44b   :  { %2279 = vrcp.f32 %v1467_v18  ;;  %v1479_v34 = vand.u32 2147483648, %v1467_v18  ;;  %v1477_v46 = vand.u32 2147483647, %v1467_v18  ;;  %vm1473_vm13 = vweird.f32 %v1467_v18 }
 0x44c   :  { %2281 = vrcp.f32 %v1487_v13 }
 0x44d   :  { %v1480_v30 = vor.u32 1.1754944e-38, %v1479_v34  ;;  %vm1478_vm15 = vcmp.eq.f32.partialorder %v1477_v46, 8.507059e+37 }
 0x451   :  { %v2280_v1 = vpop.eup %2279 }
 0x452   :  { %v2282_v52 = vpop.eup %2281  ;;  %v1469_v61 = vmul.f32 %v2280_v1, %v1467_v18  ;;  %vm1474_vm12 = vweird.f32 %v2280_v1 }
 0x453   :  { %v1489_v39 = vmul.f32 %v2282_v52, %v1487_v13  ;;  %vm1475_vm14 = vmor %vm1473_vm13, %vm1474_vm12  ;;  %vm1494_vm0 = vweird.f32 %v2282_v52 }
 0x454   :  { %v1470_v3 = vsub.f32 1.0, %v1469_v61  ;;  %vm1495_vm2 = vmor %vm1493_vm1, %vm1494_vm0 }
 0x455   :  { %v1490_v12 = vsub.f32 1.0, %v1489_v39 }
 0x456   :  { %v1471_v40 = vmul.f32 %v2280_v1, %v1470_v3 }
 0x457   :  { %v1491_v43 = vmul.f32 %v2282_v52, %v1490_v12 }
 0x458   :  { %v1472_v57 = vadd.f32 %v2280_v1, %v1471_v40 }
 0x459   :  { %v1492_v47 = vadd.f32 %v2282_v52, %v1491_v43 }
 0x45a   :  { %v1476_v41 = vsel %vm1475_vm14, %v2280_v1, %v1472_v57 }
 0x45b   :  { %v1481_v8 = vsel %vm1478_vm15, %v1480_v30, %v1476_v41  ;;  %v1496_v51 = vsel %vm1495_vm2, %v2282_v52, %v1492_v47 }
 0x45c   :  { %v1504_v48 = vmul.f32 %v1503_v31, %v1481_v8  ;;  %v1501_v63 = vsel %vm1498_vm3, %v1500_v56, %v1496_v51 }
 0x45e   :  { %v1505_v15 = vadd.f32 %v1504_v48, %v1422_v29 }
 0x460   :  { %2283 = vtanh.f32 %v1505_v15 }
 0x466   :  { %v2284_v0 = vpop.eup %2283 }
 0x467   :  { %v1507_v5 = vsub.f32 %v2883_v26, %v2284_v0 }
 0x469   :  { %v1508_v62 = vmul.f32 %v1507_v5, %v1501_v63 }
 0x46b   :  { %v1509_v14 = vadd.f32 %v2284_v0, %v1508_v62 }
 0x46d   :  { %v1516_v19 = vsel %vm1515_vm4, %v1509_v14, %v2883_v26 }
 0x46e   :  { %v1517_v7 = vmax.f32 %v1516_v19, 0.0 }
 0x470   :  { %v1518_v4 = vpack.c.bf16 %v1517_v7, %v1517_v7 }
 0x472   :  { %1670 = vmatmul.bf16.vlgmr.msrb.gmra.mxu3 %v1518_v4 }
 0x4f5   :  { %v1671_v16 = vpop.f32.mrf.mxu3 }
 0x4f6   :  { %v1672_v21 = vadd.f32 %v1671_v16, %v2878_v58 }
 0x4f8   :  { %v1679_v22 = vadd.f32 %v2224_v11, %v1672_v21 }
 0x4fa   :  { %1680 = vst [vmem:[#allocation14] sm:$0xff] %v1679_v22 }
 0x4fb   :  { %1691 = dma.vmem_to_hbm [thread:$0]  %s1687_s19, 128, %s1689_s20, [#allocation5]  }
 0x4fd   :  { %v1673_v26 = vpop.f32.mrf.mxu3 }
 0x4fe   :  { %2461 = dma.done.wait [#allocation5], 128  }
 0x4ff   :  { %2462 = vsyncadd [#allocation5], 4294967168 }
 0x500   :  { %1696 = vsyncpa [#allocation4], 1 }
 0x501   :  { %1697 = vsyncpa [#allocation7], 1 }
 0x502   :  { %1698 = vsyncpa [#allocation10], 1 }
 0x503   :  { %1699 = vsyncpa [#allocation13], 1 }
 0x504   :  { %1700 = vsyncpa [#allocation5], 1 }

</bundles_post_ra>
